<compile_context>
chip_gen: v7x
topology: tpu7x:2x2x1
jax: 0.10.0
libtpu: 0.0.40
codegen_flags: <defaults>
</compile_context>

<pallas_src>
import functools
import numpy as np

import jax
import jax.numpy as jnp
from jax import lax
from jax.experimental import pallas as pl
from jax.experimental.pallas import tpu as pltpu


POOLING_SUM = 0
POOLING_MEAN = 1

_SUBLANES = 8  # samples processed together (one vreg sublane group)


def _round_up(x, m):
    return ((x + m - 1) // m) * m


def _chip_params():
    """Best-effort chip query: (physical VMEM bytes, preferred MXU M-tile)."""
    phys_vmem = 64 << 20  # conservative default (v7x per-core VMEM)
    try:
        info = pltpu.get_tpu_info()
        phys_vmem = int(getattr(info, "vmem_capacity_bytes", phys_vmem))
    except Exception:
        pass
    kind = ""
    try:
        kind = jax.devices()[0].device_kind.lower()
    except Exception:
        pass
    # 256-wide MXU on v6e / v7x; 128-wide on v4 / v5e / v5p.
    mxu_m = 256 if any(s in kind for s in ("v6", "v7", "7x")) else 128
    return phys_vmem, mxu_m


def _embedding_bag_kernel(
    offs_ref,    # SMEM (scalar prefetch): int32[T*B + 1]
    inds_ref,    # SMEM (scalar prefetch): int32[N]
    ftm_ref,     # SMEM (scalar prefetch): int32[T] grid-t -> table idx (index_map only)
    fperm_ref,   # SMEM (scalar prefetch): int32[T] grid-t -> original feature idx
    psw_ref,     # SMEM input: float32[N] per-sample weights
    w_ref,       # VMEM: (R_pad, D_pad) table for the current feature
    out_ref,     # VMEM: (B_TILE, D_pad) output block for this (feature, b-tile)
    c_ref,       # VMEM scratch: (B_TILE, R_pad) pooled one-hot coefficients
    *,
    pooling_mode,
    batch_size,
    b_tile,
    matmul_precision,
):
    del ftm_ref  # consumed by the weights index_map, not needed in the body
    t = pl.program_id(0)
    bt = pl.program_id(1)
    f = fperm_ref[t]                 # original feature id (offsets are in original order)
    f_base = f * batch_size
    r_pad = c_ref.shape[1]
    max_pos = inds_ref.shape[0] - 1

    # Hoisted constants (never rebuilt inside loops).
    lane_iota = lax.broadcasted_iota(jnp.int32, (1, r_pad), 1)         # (1, R_pad)
    sub_iota = lax.broadcasted_iota(jnp.int32, (_SUBLANES, 1), 0)      # (8, 1)
    row_masks = [sub_iota == k for k in range(_SUBLANES)]

    def build_col(scalars, dtype):
        # Stage 8 scalars into an (8, 1) column (register-only build).
        col = jnp.full((_SUBLANES, 1), scalars[0], dtype=dtype)
        for k in range(1, _SUBLANES):
            col = jnp.where(row_masks[k], scalars[k], col)
        return col

    n_sample_groups = b_tile // _SUBLANES

    def sample_group_body(bg, carry):
        b0 = bt * b_tile + bg * _SUBLANES
        starts = []
        lens = []
        for k in range(_SUBLANES):
            b = b0 + k
            valid = b < batch_size
            lin = f_base + jnp.minimum(b, batch_size - 1)
            s = offs_ref[lin]
            e = offs_ref[lin + 1]
            starts.append(s)
            lens.append(jnp.where(valid, e - s, 0))
        len_col = build_col(lens, jnp.int32)            # (8, 1)
        max_len = lens[0]
        for k in range(1, _SUBLANES):
            max_len = jnp.maximum(max_len, lens[k])

        def pos_body(j, acc8):
            idx_scalars = []
            w_scalars = []
            for k in range(_SUBLANES):
                p = jnp.minimum(starts[k] + j, max_pos)   # clamp keeps SMEM reads in-bounds
                idx_scalars.append(inds_ref[p])
                w_scalars.append(psw_ref[p])
            idx_col = build_col(idx_scalars, jnp.int32)   # (8, 1)
            w_col = build_col(w_scalars, jnp.float32)     # (8, 1)
            w_col = jnp.where(j < len_col, w_col, 0.0)    # mask positions past each bag end
            # Single (8,1)-vs-(1,R_pad) broadcast compare -> (8, R_pad) weighted one-hot.
            return acc8 + jnp.where(lane_iota == idx_col, w_col, 0.0)

        acc8 = lax.fori_loop(0, max_len, pos_body,
                             jnp.zeros((_SUBLANES, r_pad), jnp.float32))

        if pooling_mode == POOLING_MEAN:
            # NOTE: per_sample_weights are applied before the mean, matching the
            # reference below (fbgemm restricts per_sample_weights to SUM pooling).
            acc8 = acc8 * (1.0 / jnp.maximum(len_col, 1).astype(jnp.float32))

        row0 = pl.multiple_of(bg * _SUBLANES, _SUBLANES)
        c_ref[pl.ds(row0, _SUBLANES), :] = acc8           # aligned, unmasked (8, R_pad) store
        return carry

    lax.fori_loop(0, n_sample_groups, sample_group_body, 0)

    # One MXU matmul per (feature, B-tile): (B_TILE, R_pad) @ (R_pad, D_pad).
    out_ref[...] = jnp.dot(
        c_ref[...], w_ref[...],
        preferred_element_type=jnp.float32,
        precision=matmul_precision,
    ).astype(out_ref.dtype)


class DenseTableBatchedEmbeddingBags:
    """JAX/Pallas equivalent of DenseTableBatchedEmbeddingBagsCodegen (forward)."""

    def __init__(self, embedding_specs, feature_table_map=None,
                 pooling_mode=POOLING_SUM, seed=0,
                 matmul_precision=lax.Precision.HIGHEST):
        self.embedding_specs = list(embedding_specs)
        rows, dims = zip(*embedding_specs)
        T_ = len(embedding_specs)
        assert T_ > 0
        feature_table_map = (feature_table_map if feature_table_map is not None
                             else list(range(T_)))
        self.feature_table_map = list(feature_table_map)
        self.T = len(self.feature_table_map)
        assert T_ <= self.T
        d_off = [dims[t] for t in self.feature_table_map]
        self.D_offsets = [0] + list(np.cumsum(d_off).astype(int))
        self.total_D = int(self.D_offsets[-1])
        self.max_D = int(max(dims))
        self.pooling_mode = pooling_mode
        self.matmul_precision = matmul_precision

        # Backward-pass bucketization metadata (kept for spec fidelity; unused in fwd).
        hsc = [0] + list(np.cumsum(rows).astype(int))
        self.total_hash_size_bits = int(np.log2(float(hsc[-1])) + 1)
        self.hash_size_cumsum = [hsc[t] for t in self.feature_table_map] + [hsc[-1]]

        w_off = [0] + list(np.cumsum([r * d for r, d in embedding_specs]).astype(int))
        self.weights_physical_offsets = w_off
        # deterministic init (analog of torch.randn on the flat parameter)
        key = jax.random.PRNGKey(seed)
        self.weights = jax.random.normal(key, (int(w_off[-1]),), dtype=jnp.float32)

        # Padded stacked per-table view of the flat weights (pure glue).
        #   R_pad / D_pad: multiples of 128 -> unmasked full-lane loads/stores and
        #   full-width MXU contraction. (256-multiples only matter for very large D.)
        self.R_max = int(max(rows))
        self.R_pad = _round_up(max(self.R_max, 1), 128)
        self.D_pad = _round_up(max(self.max_D, 1), 128)
        tables = np.zeros((T_, self.R_pad, self.D_pad), dtype=np.float32)
        w_np = np.asarray(self.weights)
        for t, (r, d) in enumerate(embedding_specs):
            off = w_off[t]
            tables[t, :r, :d] = w_np[off:off + r * d].reshape(r, d)
        self.tables = jnp.asarray(tables)
        # TODO(synk): for production-sized tables (R too big for VMEM residency) cut
        # over to memory_space=pl.ANY + manual per-bag row-gather DMA with VPU
        # accumulation; the one-hot MXU path only scales to small R_pad.

    def __call__(self, indices, offsets, per_sample_weights=None):
        T = self.T
        B = (offsets.shape[0] - 1) // T
        assert B >= 1 and offsets.shape[0] == T * B + 1
        indices = jnp.asarray(indices).astype(jnp.int32)
        offsets = jnp.asarray(offsets).astype(jnp.int32)
        n_idx = int(indices.shape[0])
        if n_idx == 0:  # keep SMEM arrays non-empty
            indices = jnp.zeros((1,), jnp.int32)
            psw = jnp.zeros((1,), jnp.float32)
        elif per_sample_weights is None:
            psw = jnp.ones((n_idx,), jnp.float32)
        else:
            psw = jnp.asarray(per_sample_weights).astype(jnp.float32)

        # Permute features so same-table features are adjacent on the grid's t axis:
        # consecutive grid steps with identical table block index skip the table DMA.
        order = np.argsort(np.asarray(self.feature_table_map), kind="stable")
        ftm_perm = jnp.asarray([self.feature_table_map[int(p)] for p in order], jnp.int32)
        fperm = jnp.asarray(order, jnp.int32)

        R_pad, D_pad = self.R_pad, self.D_pad
        phys_vmem, mxu_m = _chip_params()
        vmem_budget = int(phys_vmem * 0.75)
        table_bytes = R_pad * D_pad * 4

        def vmem_need(b_tile, table_buffers):
            return (table_buffers * table_bytes       # resident table copies
                    + 2 * b_tile * D_pad * 4          # double-buffered output block
                    + b_tile * R_pad * 4              # C scratch
                    + (2 << 20))                      # margin for compiler internals

        # Fill the MXU M dim (256 on v6e/v7x, 128 otherwise) subject to the VMEM budget.
        B_TILE = min(mxu_m, _round_up(max(B, 1), _SUBLANES))
        table_buffers = 2 if vmem_need(B_TILE, 2) <= vmem_budget else 1
        while B_TILE > _SUBLANES and vmem_need(B_TILE, table_buffers) > vmem_budget:
            B_TILE = max(_SUBLANES, _round_up(B_TILE // 2, _SUBLANES))
        if vmem_need(B_TILE, table_buffers) > vmem_budget:
            # TODO(synk): large-table path (pl.ANY + row-gather DMA) not implemented.
            raise NotImplementedError("embedding table too large for VMEM-resident kernel")
        num_bt = pl.cdiv(B, B_TILE)
        B_pad = num_bt * B_TILE

        # Always set the scoped-VMEM limit explicitly (v5e's default is only 16 MiB).
        vmem_limit = int(min(max(vmem_need(B_TILE, table_buffers), 32 << 20),
                             int(phys_vmem * 0.9)))

        def table_index_map(t, bt, offs, inds, ftm, fprm):
            return (ftm[t], 0, 0)

        table_spec_kwargs = {}
        if table_buffers == 1:
            # Single-buffer the table (its block index only changes at feature
            # boundaries, so the exposed DMA amortizes over num_bt steps).
            table_spec_kwargs["pipeline_mode"] = pl.Buffered(1)
        table_spec = pl.BlockSpec((None, R_pad, D_pad), table_index_map,
                                  **table_spec_kwargs)

        kernel = functools.partial(
            _embedding_bag_kernel,
            pooling_mode=self.pooling_mode,
            batch_size=B,
            b_tile=B_TILE,
            matmul_precision=self.matmul_precision)

        out3 = pl.pallas_call(
            kernel,
            out_shape=jax.ShapeDtypeStruct((T, B_pad, D_pad), jnp.float32),
            grid_spec=pltpu.PrefetchScalarGridSpec(
                num_scalar_prefetch=4,  # offsets, indices, ftm_perm, fperm
                grid=(T, num_bt),
                in_specs=[
                    # per-sample weights: whole array in SMEM (scalar reads).
                    # TODO(synk): for production-scale N, chunk indices/psw through
                    # VMEM DMAs instead of SMEM residency (SMEM pads 1-D arrays to
                    # next_pow2 bytes and has a hard capacity cliff).
                    pl.BlockSpec(memory_space=pltpu.MemorySpace.SMEM),
                    # the table for the current feature (data-dependent via ftm_perm)
                    table_spec,
                ],
                out_specs=pl.BlockSpec(
                    (None, B_TILE, D_pad),
                    lambda t, bt, offs, inds, ftm, fprm: (t, bt, 0)),
                scratch_shapes=[pltpu.VMEM((B_TILE, R_pad), jnp.float32)],
            ),
            compiler_params=pltpu.CompilerParams(
                # Feature/table axis is the parallel one so v7x's two TensorCores
                # fetch disjoint tables instead of duplicating the table DMA.
                dimension_semantics=("parallel", "arbitrary"),
                vmem_limit_bytes=vmem_limit,
            ),
        )(offsets, indices, ftm_perm, fperm, psw, self.tables)

        # glue: un-permute features, slice each feature's true dim, concat -> (B, total_D)
        # TODO(synk): bf16 output + same-D feature grouping would cut HBM writeback and
        # concat traffic further; kept f32 to preserve the reference semantics.
        inv_order = np.empty(T, dtype=np.int64)
        inv_order[order] = np.arange(T)
        dims = [self.embedding_specs[self.feature_table_map[f]][1] for f in range(T)]
        cols = [out3[int(inv_order[f]), :B, :dims[f]] for f in range(T)]
        return jnp.concatenate(cols, axis=1)


def reference_forward(module, indices, offsets, per_sample_weights=None):
    """Pure NumPy reference matching fbgemm dense_embedding_codegen_lookup."""
    indices = np.asarray(indices)
    offsets = np.asarray(offsets)
    T = module.T
    B = (offsets.shape[0] - 1) // T
    w = np.asarray(module.weights)
    psw = (np.ones(indices.shape[0], dtype=np.float32)
           if per_sample_weights is None
           else np.asarray(per_sample_weights, dtype=np.float32))
    out = np.zeros((B, module.total_D), dtype=np.float32)
    for f in range(T):
        t = module.feature_table_map[f]
        r, d = module.embedding_specs[t]
        off = module.weights_physical_offsets[t]
        tbl = w[off:off + r * d].reshape(r, d)
        for b in range(B):
            s, e = int(offsets[f * B + b]), int(offsets[f * B + b + 1])
            idx = indices[s:e]
            vals = tbl[idx] * psw[s:e, None]
            pooled = vals.sum(0) if e > s else np.zeros(d, np.float32)
            if module.pooling_mode == POOLING_MEAN and e > s:
                pooled = pooled / float(e - s)
            out[b, module.D_offsets[f]:module.D_offsets[f + 1]] = pooled
    return out


if __name__ == "__main__":
    # small deterministic setup
    embedding_specs = [(40, 16), (64, 32), (24, 16)]   # (rows, dim) per table
    feature_table_map = [0, 1, 2, 1]                   # table 1 shared by 2 features
    T = len(feature_table_map)
    B = 3

    key = jax.random.PRNGKey(0)
    k_len, k_idx, k_w = jax.random.split(key, 3)
    lengths = np.array(jax.random.randint(k_len, (T, B), 0, 5))
    if lengths.sum() == 0:
        lengths[0, 0] = 1
    offsets = np.concatenate([[0], np.cumsum(lengths.reshape(-1))]).astype(np.int32)

    idx_parts = []
    ks = jax.random.split(k_idx, T)
    for f in range(T):
        n_f = int(lengths[f].sum())
        rows_f = embedding_specs[feature_table_map[f]][0]
        idx_parts.append(np.array(
            jax.random.randint(ks[f], (n_f,), 0, rows_f), dtype=np.int32))
    indices = np.concatenate(idx_parts).astype(np.int32)
    per_sample_weights = np.array(
        jax.random.uniform(k_w, (indices.shape[0],), minval=0.5, maxval=1.5),
        dtype=np.float32)

    # SUM pooling with per-sample weights (exact f32 matmul path)
    mod_sum = DenseTableBatchedEmbeddingBags(
        embedding_specs, feature_table_map, pooling_mode=POOLING_SUM, seed=0)
    out_sum = mod_sum(jnp.asarray(indices), jnp.asarray(offsets),
                      jnp.asarray(per_sample_weights))

    # MEAN pooling without per-sample weights (exact f32 matmul path)
    mod_mean = DenseTableBatchedEmbeddingBags(
        embedding_specs, feature_table_map, pooling_mode=POOLING_MEAN, seed=0)
    out_mean = mod_mean(jnp.asarray(indices), jnp.asarray(offsets))

    # Fast MXU path: DEFAULT precision (bf16 passes), validated at loose tolerance.
    mod_fast = DenseTableBatchedEmbeddingBags(
        embedding_specs, feature_table_map, pooling_mode=POOLING_SUM, seed=0,
        matmul_precision=lax.Precision.DEFAULT)
    out_fast = mod_fast(jnp.asarray(indices), jnp.asarray(offsets),
                        jnp.asarray(per_sample_weights))

    jax.block_until_ready((out_sum, out_mean, out_fast))

    ref_sum = reference_forward(mod_sum, indices, offsets, per_sample_weights)
    ref_mean = reference_forward(mod_mean, indices, offsets)
    np.testing.assert_allclose(np.asarray(out_sum), ref_sum, rtol=1e-4, atol=1e-4)
    np.testing.assert_allclose(np.asarray(out_mean), ref_mean, rtol=1e-4, atol=1e-4)
    np.testing.assert_allclose(np.asarray(out_fast), ref_sum, rtol=1e-1, atol=3e-1)
    assert out_sum.shape == (B, mod_sum.total_D)
    assert out_mean.shape == (B, mod_mean.total_D)
    print("KERNEL_OK")
</pallas_src>

<mosaic_0001>
module attributes {stable_mosaic.version = 11 : i64} {
  func.func @_embedding_bag_kernel(%arg0: i32, %arg1: i32, %arg2: memref<13xi32, #tpu.memory_space<smem>>, %arg3: memref<18xi32, #tpu.memory_space<smem>>, %arg4: memref<4xi32, #tpu.memory_space<smem>>, %arg5: memref<4xi32, #tpu.memory_space<smem>>, %arg6: memref<18xf32, #tpu.memory_space<smem>>, %arg7: memref<1x128x128xf32, #tpu.memory_space<vmem>>, %arg8: memref<1x8x128xf32, #tpu.memory_space<vmem>>, %arg9: memref<8x128xf32, #tpu.memory_space<vmem>>) attributes {dimension_semantics = [#tpu.dimension_semantics<parallel>, #tpu.dimension_semantics<arbitrary>], iteration_bounds = array<i64: 4, 1>, scalar_prefetch = 4 : i64, scratch_operands = 1 : i64, tpu.core_type = #tpu.core_type<tc>, window_params = [{transform_indices = @transform_0, window_bounds = array<i64: 18>}, {transform_indices = @transform_1, window_bounds = array<i64: 1, 128, 128>}, {transform_indices = @transform_2, window_bounds = array<i64: 1, 8, 128>}]} {
    %0 = arith.index_cast %arg0 : i32 to index
    %1 = memref.load %arg5[%0] : memref<4xi32, #tpu.memory_space<smem>>
    %c3_i32 = arith.constant 3 : i32
    %2 = arith.muli %1, %c3_i32 : i32
    %3 = tpu.iota {dimensions = array<i32: 1>} : vector<1x128xi32>
    %4 = tpu.iota {dimensions = array<i32: 0>} : vector<8x1xi32>
    %c1_i32 = arith.constant 1 : i32
    %5 = vector.broadcast %c1_i32 : i32 to vector<8x1xi32>
    %6 = arith.cmpi eq, %4, %5 : vector<8x1xi32>
    %c2_i32 = arith.constant 2 : i32
    %7 = vector.broadcast %c2_i32 : i32 to vector<8x1xi32>
    %8 = arith.cmpi eq, %4, %7 : vector<8x1xi32>
    %c3_i32_0 = arith.constant 3 : i32
    %9 = vector.broadcast %c3_i32_0 : i32 to vector<8x1xi32>
    %10 = arith.cmpi eq, %4, %9 : vector<8x1xi32>
    %c4_i32 = arith.constant 4 : i32
    %11 = vector.broadcast %c4_i32 : i32 to vector<8x1xi32>
    %12 = arith.cmpi eq, %4, %11 : vector<8x1xi32>
    %c5_i32 = arith.constant 5 : i32
    %13 = vector.broadcast %c5_i32 : i32 to vector<8x1xi32>
    %14 = arith.cmpi eq, %4, %13 : vector<8x1xi32>
    %c6_i32 = arith.constant 6 : i32
    %15 = vector.broadcast %c6_i32 : i32 to vector<8x1xi32>
    %16 = arith.cmpi eq, %4, %15 : vector<8x1xi32>
    %c7_i32 = arith.constant 7 : i32
    %17 = vector.broadcast %c7_i32 : i32 to vector<8x1xi32>
    %18 = arith.cmpi eq, %4, %17 : vector<8x1xi32>
    %c0_i32 = arith.constant 0 : i32
    %c8_i32 = arith.constant 8 : i32
    %19 = arith.muli %arg1, %c8_i32 : i32
    %c8_i32_1 = arith.constant 8 : i32
    %20 = arith.muli %c0_i32, %c8_i32_1 : i32
    %21 = arith.addi %19, %20 : i32
    %c0_i32_2 = arith.constant 0 : i32
    %22 = arith.addi %21, %c0_i32_2 : i32
    %c3_i32_3 = arith.constant 3 : i32
    %23 = arith.cmpi slt, %22, %c3_i32_3 : i32
    %c2_i32_4 = arith.constant 2 : i32
    %24 = arith.minsi %22, %c2_i32_4 : i32
    %25 = arith.addi %2, %24 : i32
    %26 = arith.index_cast %25 : i32 to index
    %27 = memref.load %arg2[%26] : memref<13xi32, #tpu.memory_space<smem>>
    %c1_i32_5 = arith.constant 1 : i32
    %28 = arith.addi %25, %c1_i32_5 : i32
    %29 = arith.index_cast %28 : i32 to index
    %30 = memref.load %arg2[%29] : memref<13xi32, #tpu.memory_space<smem>>
    %31 = arith.subi %30, %27 : i32
    %c0_i32_6 = arith.constant 0 : i32
    %32 = arith.select %23, %31, %c0_i32_6 : i32
    %c1_i32_7 = arith.constant 1 : i32
    %33 = arith.addi %21, %c1_i32_7 : i32
    %c3_i32_8 = arith.constant 3 : i32
    %34 = arith.cmpi slt, %33, %c3_i32_8 : i32
    %c2_i32_9 = arith.constant 2 : i32
    %35 = arith.minsi %33, %c2_i32_9 : i32
    %36 = arith.addi %2, %35 : i32
    %37 = arith.index_cast %36 : i32 to index
    %38 = memref.load %arg2[%37] : memref<13xi32, #tpu.memory_space<smem>>
    %c1_i32_10 = arith.constant 1 : i32
    %39 = arith.addi %36, %c1_i32_10 : i32
    %40 = arith.index_cast %39 : i32 to index
    %41 = memref.load %arg2[%40] : memref<13xi32, #tpu.memory_space<smem>>
    %42 = arith.subi %41, %38 : i32
    %c0_i32_11 = arith.constant 0 : i32
    %43 = arith.select %34, %42, %c0_i32_11 : i32
    %c2_i32_12 = arith.constant 2 : i32
    %44 = arith.addi %21, %c2_i32_12 : i32
    %c3_i32_13 = arith.constant 3 : i32
    %45 = arith.cmpi slt, %44, %c3_i32_13 : i32
    %c2_i32_14 = arith.constant 2 : i32
    %46 = arith.minsi %44, %c2_i32_14 : i32
    %47 = arith.addi %2, %46 : i32
    %48 = arith.index_cast %47 : i32 to index
    %49 = memref.load %arg2[%48] : memref<13xi32, #tpu.memory_space<smem>>
    %c1_i32_15 = arith.constant 1 : i32
    %50 = arith.addi %47, %c1_i32_15 : i32
    %51 = arith.index_cast %50 : i32 to index
    %52 = memref.load %arg2[%51] : memref<13xi32, #tpu.memory_space<smem>>
    %53 = arith.subi %52, %49 : i32
    %c0_i32_16 = arith.constant 0 : i32
    %54 = arith.select %45, %53, %c0_i32_16 : i32
    %c3_i32_17 = arith.constant 3 : i32
    %55 = arith.addi %21, %c3_i32_17 : i32
    %c3_i32_18 = arith.constant 3 : i32
    %56 = arith.cmpi slt, %55, %c3_i32_18 : i32
    %c2_i32_19 = arith.constant 2 : i32
    %57 = arith.minsi %55, %c2_i32_19 : i32
    %58 = arith.addi %2, %57 : i32
    %59 = arith.index_cast %58 : i32 to index
    %60 = memref.load %arg2[%59] : memref<13xi32, #tpu.memory_space<smem>>
    %c1_i32_20 = arith.constant 1 : i32
    %61 = arith.addi %58, %c1_i32_20 : i32
    %62 = arith.index_cast %61 : i32 to index
    %63 = memref.load %arg2[%62] : memref<13xi32, #tpu.memory_space<smem>>
    %64 = arith.subi %63, %60 : i32
    %c0_i32_21 = arith.constant 0 : i32
    %65 = arith.select %56, %64, %c0_i32_21 : i32
    %c4_i32_22 = arith.constant 4 : i32
    %66 = arith.addi %21, %c4_i32_22 : i32
    %c3_i32_23 = arith.constant 3 : i32
    %67 = arith.cmpi slt, %66, %c3_i32_23 : i32
    %c2_i32_24 = arith.constant 2 : i32
    %68 = arith.minsi %66, %c2_i32_24 : i32
    %69 = arith.addi %2, %68 : i32
    %70 = arith.index_cast %69 : i32 to index
    %71 = memref.load %arg2[%70] : memref<13xi32, #tpu.memory_space<smem>>
    %c1_i32_25 = arith.constant 1 : i32
    %72 = arith.addi %69, %c1_i32_25 : i32
    %73 = arith.index_cast %72 : i32 to index
    %74 = memref.load %arg2[%73] : memref<13xi32, #tpu.memory_space<smem>>
    %75 = arith.subi %74, %71 : i32
    %c0_i32_26 = arith.constant 0 : i32
    %76 = arith.select %67, %75, %c0_i32_26 : i32
    %c5_i32_27 = arith.constant 5 : i32
    %77 = arith.addi %21, %c5_i32_27 : i32
    %c3_i32_28 = arith.constant 3 : i32
    %78 = arith.cmpi slt, %77, %c3_i32_28 : i32
    %c2_i32_29 = arith.constant 2 : i32
    %79 = arith.minsi %77, %c2_i32_29 : i32
    %80 = arith.addi %2, %79 : i32
    %81 = arith.index_cast %80 : i32 to index
    %82 = memref.load %arg2[%81] : memref<13xi32, #tpu.memory_space<smem>>
    %c1_i32_30 = arith.constant 1 : i32
    %83 = arith.addi %80, %c1_i32_30 : i32
    %84 = arith.index_cast %83 : i32 to index
    %85 = memref.load %arg2[%84] : memref<13xi32, #tpu.memory_space<smem>>
    %86 = arith.subi %85, %82 : i32
    %c0_i32_31 = arith.constant 0 : i32
    %87 = arith.select %78, %86, %c0_i32_31 : i32
    %c6_i32_32 = arith.constant 6 : i32
    %88 = arith.addi %21, %c6_i32_32 : i32
    %c3_i32_33 = arith.constant 3 : i32
    %89 = arith.cmpi slt, %88, %c3_i32_33 : i32
    %c2_i32_34 = arith.constant 2 : i32
    %90 = arith.minsi %88, %c2_i32_34 : i32
    %91 = arith.addi %2, %90 : i32
    %92 = arith.index_cast %91 : i32 to index
    %93 = memref.load %arg2[%92] : memref<13xi32, #tpu.memory_space<smem>>
    %c1_i32_35 = arith.constant 1 : i32
    %94 = arith.addi %91, %c1_i32_35 : i32
    %95 = arith.index_cast %94 : i32 to index
    %96 = memref.load %arg2[%95] : memref<13xi32, #tpu.memory_space<smem>>
    %97 = arith.subi %96, %93 : i32
    %c0_i32_36 = arith.constant 0 : i32
    %98 = arith.select %89, %97, %c0_i32_36 : i32
    %c7_i32_37 = arith.constant 7 : i32
    %99 = arith.addi %21, %c7_i32_37 : i32
    %c3_i32_38 = arith.constant 3 : i32
    %100 = arith.cmpi slt, %99, %c3_i32_38 : i32
    %c2_i32_39 = arith.constant 2 : i32
    %101 = arith.minsi %99, %c2_i32_39 : i32
    %102 = arith.addi %2, %101 : i32
    %103 = arith.index_cast %102 : i32 to index
    %104 = memref.load %arg2[%103] : memref<13xi32, #tpu.memory_space<smem>>
    %c1_i32_40 = arith.constant 1 : i32
    %105 = arith.addi %102, %c1_i32_40 : i32
    %106 = arith.index_cast %105 : i32 to index
    %107 = memref.load %arg2[%106] : memref<13xi32, #tpu.memory_space<smem>>
    %108 = arith.subi %107, %104 : i32
    %c0_i32_41 = arith.constant 0 : i32
    %109 = arith.select %100, %108, %c0_i32_41 : i32
    %110 = vector.broadcast %32 : i32 to vector<8x1xi32>
    %111 = vector.broadcast %43 : i32 to vector<8x1xi32>
    %112 = arith.select %6, %111, %110 : vector<8x1xi1>, vector<8x1xi32>
    %113 = vector.broadcast %54 : i32 to vector<8x1xi32>
    %114 = arith.select %8, %113, %112 : vector<8x1xi1>, vector<8x1xi32>
    %115 = vector.broadcast %65 : i32 to vector<8x1xi32>
    %116 = arith.select %10, %115, %114 : vector<8x1xi1>, vector<8x1xi32>
    %117 = vector.broadcast %76 : i32 to vector<8x1xi32>
    %118 = arith.select %12, %117, %116 : vector<8x1xi1>, vector<8x1xi32>
    %119 = vector.broadcast %87 : i32 to vector<8x1xi32>
    %120 = arith.select %14, %119, %118 : vector<8x1xi1>, vector<8x1xi32>
    %121 = vector.broadcast %98 : i32 to vector<8x1xi32>
    %122 = arith.select %16, %121, %120 : vector<8x1xi1>, vector<8x1xi32>
    %123 = vector.broadcast %109 : i32 to vector<8x1xi32>
    %124 = arith.select %18, %123, %122 : vector<8x1xi1>, vector<8x1xi32>
    %125 = arith.maxsi %32, %43 : i32
    %126 = arith.maxsi %125, %54 : i32
    %127 = arith.maxsi %126, %65 : i32
    %128 = arith.maxsi %127, %76 : i32
    %129 = arith.maxsi %128, %87 : i32
    %130 = arith.maxsi %129, %98 : i32
    %131 = arith.maxsi %130, %109 : i32
    %cst = arith.constant 0.000000e+00 : f32
    %132 = vector.broadcast %cst : f32 to vector<8x128xf32>
    %c0_i32_42 = arith.constant 0 : i32
    %133 = arith.subi %131, %c0_i32_42 : i32
    %134 = arith.addi %c0_i32_42, %133 : i32
    %c1_i32_43 = arith.constant 1 : i32
    %135 = scf.for %arg10 = %c0_i32_42 to %134 step %c1_i32_43 iter_args(%arg11 = %132) -> (vector<8x128xf32>)  : i32 {
      %147 = arith.addi %27, %arg10 : i32
      %c17_i32 = arith.constant 17 : i32
      %148 = arith.minsi %147, %c17_i32 : i32
      %149 = arith.index_cast %148 : i32 to index
      %150 = memref.load %arg3[%149] : memref<18xi32, #tpu.memory_space<smem>>
      %151 = arith.index_cast %148 : i32 to index
      %152 = memref.load %arg6[%151] : memref<18xf32, #tpu.memory_space<smem>>
      %153 = arith.addi %38, %arg10 : i32
      %c17_i32_55 = arith.constant 17 : i32
      %154 = arith.minsi %153, %c17_i32_55 : i32
      %155 = arith.index_cast %154 : i32 to index
      %156 = memref.load %arg3[%155] : memref<18xi32, #tpu.memory_space<smem>>
      %157 = arith.index_cast %154 : i32 to index
      %158 = memref.load %arg6[%157] : memref<18xf32, #tpu.memory_space<smem>>
      %159 = arith.addi %49, %arg10 : i32
      %c17_i32_56 = arith.constant 17 : i32
      %160 = arith.minsi %159, %c17_i32_56 : i32
      %161 = arith.index_cast %160 : i32 to index
      %162 = memref.load %arg3[%161] : memref<18xi32, #tpu.memory_space<smem>>
      %163 = arith.index_cast %160 : i32 to index
      %164 = memref.load %arg6[%163] : memref<18xf32, #tpu.memory_space<smem>>
      %165 = arith.addi %60, %arg10 : i32
      %c17_i32_57 = arith.constant 17 : i32
      %166 = arith.minsi %165, %c17_i32_57 : i32
      %167 = arith.index_cast %166 : i32 to index
      %168 = memref.load %arg3[%167] : memref<18xi32, #tpu.memory_space<smem>>
      %169 = arith.index_cast %166 : i32 to index
      %170 = memref.load %arg6[%169] : memref<18xf32, #tpu.memory_space<smem>>
      %171 = arith.addi %71, %arg10 : i32
      %c17_i32_58 = arith.constant 17 : i32
      %172 = arith.minsi %171, %c17_i32_58 : i32
      %173 = arith.index_cast %172 : i32 to index
      %174 = memref.load %arg3[%173] : memref<18xi32, #tpu.memory_space<smem>>
      %175 = arith.index_cast %172 : i32 to index
      %176 = memref.load %arg6[%175] : memref<18xf32, #tpu.memory_space<smem>>
      %177 = arith.addi %82, %arg10 : i32
      %c17_i32_59 = arith.constant 17 : i32
      %178 = arith.minsi %177, %c17_i32_59 : i32
      %179 = arith.index_cast %178 : i32 to index
      %180 = memref.load %arg3[%179] : memref<18xi32, #tpu.memory_space<smem>>
      %181 = arith.index_cast %178 : i32 to index
      %182 = memref.load %arg6[%181] : memref<18xf32, #tpu.memory_space<smem>>
      %183 = arith.addi %93, %arg10 : i32
      %c17_i32_60 = arith.constant 17 : i32
      %184 = arith.minsi %183, %c17_i32_60 : i32
      %185 = arith.index_cast %184 : i32 to index
      %186 = memref.load %arg3[%185] : memref<18xi32, #tpu.memory_space<smem>>
      %187 = arith.index_cast %184 : i32 to index
      %188 = memref.load %arg6[%187] : memref<18xf32, #tpu.memory_space<smem>>
      %189 = arith.addi %104, %arg10 : i32
      %c17_i32_61 = arith.constant 17 : i32
      %190 = arith.minsi %189, %c17_i32_61 : i32
      %191 = arith.index_cast %190 : i32 to index
      %192 = memref.load %arg3[%191] : memref<18xi32, #tpu.memory_space<smem>>
      %193 = arith.index_cast %190 : i32 to index
      %194 = memref.load %arg6[%193] : memref<18xf32, #tpu.memory_space<smem>>
      %195 = vector.broadcast %150 : i32 to vector<8x1xi32>
      %196 = vector.broadcast %156 : i32 to vector<8x1xi32>
      %197 = arith.select %6, %196, %195 : vector<8x1xi1>, vector<8x1xi32>
      %198 = vector.broadcast %162 : i32 to vector<8x1xi32>
      %199 = arith.select %8, %198, %197 : vector<8x1xi1>, vector<8x1xi32>
      %200 = vector.broadcast %168 : i32 to vector<8x1xi32>
      %201 = arith.select %10, %200, %199 : vector<8x1xi1>, vector<8x1xi32>
      %202 = vector.broadcast %174 : i32 to vector<8x1xi32>
      %203 = arith.select %12, %202, %201 : vector<8x1xi1>, vector<8x1xi32>
      %204 = vector.broadcast %180 : i32 to vector<8x1xi32>
      %205 = arith.select %14, %204, %203 : vector<8x1xi1>, vector<8x1xi32>
      %206 = vector.broadcast %186 : i32 to vector<8x1xi32>
      %207 = arith.select %16, %206, %205 : vector<8x1xi1>, vector<8x1xi32>
      %208 = vector.broadcast %192 : i32 to vector<8x1xi32>
      %209 = arith.select %18, %208, %207 : vector<8x1xi1>, vector<8x1xi32>
      %210 = vector.broadcast %152 : f32 to vector<8x1xf32>
      %211 = vector.broadcast %158 : f32 to vector<8x1xf32>
      %212 = arith.select %6, %211, %210 : vector<8x1xi1>, vector<8x1xf32>
      %213 = vector.broadcast %164 : f32 to vector<8x1xf32>
      %214 = arith.select %8, %213, %212 : vector<8x1xi1>, vector<8x1xf32>
      %215 = vector.broadcast %170 : f32 to vector<8x1xf32>
      %216 = arith.select %10, %215, %214 : vector<8x1xi1>, vector<8x1xf32>
      %217 = vector.broadcast %176 : f32 to vector<8x1xf32>
      %218 = arith.select %12, %217, %216 : vector<8x1xi1>, vector<8x1xf32>
      %219 = vector.broadcast %182 : f32 to vector<8x1xf32>
      %220 = arith.select %14, %219, %218 : vector<8x1xi1>, vector<8x1xf32>
      %221 = vector.broadcast %188 : f32 to vector<8x1xf32>
      %222 = arith.select %16, %221, %220 : vector<8x1xi1>, vector<8x1xf32>
      %223 = vector.broadcast %194 : f32 to vector<8x1xf32>
      %224 = arith.select %18, %223, %222 : vector<8x1xi1>, vector<8x1xf32>
      %225 = vector.broadcast %arg10 : i32 to vector<8x1xi32>
      %226 = arith.cmpi slt, %225, %124 : vector<8x1xi32>
      %cst_62 = arith.constant 0.000000e+00 : f32
      %227 = vector.broadcast %cst_62 : f32 to vector<8x1xf32>
      %228 = arith.select %226, %224, %227 : vector<8x1xi1>, vector<8x1xf32>
      %229 = vector.broadcast %3 : vector<1x128xi32> to vector<8x128xi32>
      %230 = vector.broadcast %209 : vector<8x1xi32> to vector<8x128xi32>
      %231 = arith.cmpi eq, %229, %230 : vector<8x128xi32>
      %cst_63 = arith.constant 0.000000e+00 : f32
      %232 = vector.shape_cast %228 : vector<8x1xf32> to vector<8x1xf32>
      %233 = vector.broadcast %232 : vector<8x1xf32> to vector<8x128xf32>
      %234 = vector.broadcast %cst_63 : f32 to vector<8x128xf32>
      %235 = arith.select %231, %233, %234 : vector<8x128xi1>, vector<8x128xf32>
      %236 = arith.addf %arg11, %235 : vector<8x128xf32>
      scf.yield %236 : vector<8x128xf32>
    }
    %c8_i32_44 = arith.constant 8 : i32
    %136 = arith.muli %c0_i32, %c8_i32_44 : i32
    %137 = tpu.assume_multiple %136, 8 : i32
    %138 = arith.index_cast %137 : i32 to index
    %c0 = arith.constant 0 : index
    %139 = vector.load %arg9[%138, %c0] : memref<8x128xf32, #tpu.memory_space<vmem>>, vector<8x128xf32>
    tpu.vector_store %arg9[%138, %c0], %135 {strides = array<i32>} : memref<8x128xf32, #tpu.memory_space<vmem>>, vector<8x128xf32>,
    %c1_i32_45 = arith.constant 1 : i32
    %c0_46 = arith.constant 0 : index
    %c0_47 = arith.constant 0 : index
    %140 = vector.load %arg9[%c0_46, %c0_47] : memref<8x128xf32, #tpu.memory_space<vmem>>, vector<8x128xf32>
    %c0_48 = arith.constant 0 : index
    %c0_49 = arith.constant 0 : index
    %c0_50 = arith.constant 0 : index
    %141 = vector.load %arg7[%c0_48, %c0_49, %c0_50] : memref<1x128x128xf32, #tpu.memory_space<vmem>>, vector<1x128x128xf32>
    %142 = vector.shape_cast %141 : vector<1x128x128xf32> to vector<128x128xf32>
    %cst_51 = arith.constant dense<0.000000e+00> : vector<8x128xf32>
    %143 = tpu.matmul %140, %142, %cst_51 {dimension_numbers = #tpu.dot_dimension_numbers<[1], [0], [0], [1], [0, 0, 1, 1], [], []>, precision = #tpu.contract_precision<fp32>} : vector<8x128xf32>, vector<128x128xf32>, vector<8x128xf32> -> vector<8x128xf32>
    %c0_52 = arith.constant 0 : index
    %c0_53 = arith.constant 0 : index
    %c0_54 = arith.constant 0 : index
    %144 = vector.load %arg8[%c0_52, %c0_53, %c0_54] : memref<1x8x128xf32, #tpu.memory_space<vmem>>, vector<1x8x128xf32>
    %145 = vector.shape_cast %144 : vector<1x8x128xf32> to vector<8x128xf32>
    %146 = vector.shape_cast %143 : vector<8x128xf32> to vector<1x8x128xf32>
    tpu.vector_store %arg8[%c0_52, %c0_53, %c0_54], %146 {strides = array<i32>} : memref<1x8x128xf32, #tpu.memory_space<vmem>>, vector<1x8x128xf32>,
    return
  }
  func.func @transform_0(%arg0: i32, %arg1: i32, %arg2: memref<13xi32, #tpu.memory_space<smem>>, %arg3: memref<18xi32, #tpu.memory_space<smem>>, %arg4: memref<4xi32, #tpu.memory_space<smem>>, %arg5: memref<4xi32, #tpu.memory_space<smem>>) -> i32 {
    %c0_i32 = arith.constant 0 : i32
    %c0_i32_0 = arith.constant 0 : i32
    return %c0_i32 : i32
  }
  func.func @transform_1(%arg0: i32, %arg1: i32, %arg2: memref<13xi32, #tpu.memory_space<smem>>, %arg3: memref<18xi32, #tpu.memory_space<smem>>, %arg4: memref<4xi32, #tpu.memory_space<smem>>, %arg5: memref<4xi32, #tpu.memory_space<smem>>) -> (i32, i32, i32) {
    %0 = arith.index_cast %arg0 : i32 to index
    %1 = memref.load %arg4[%0] : memref<4xi32, #tpu.memory_space<smem>>
    %c0_i32 = arith.constant 0 : i32
    %c0_i32_0 = arith.constant 0 : i32
    %c0_i32_1 = arith.constant 0 : i32
    return %1, %c0_i32, %c0_i32_0 : i32, i32, i32
  }
  func.func @transform_2(%arg0: i32, %arg1: i32, %arg2: memref<13xi32, #tpu.memory_space<smem>>, %arg3: memref<18xi32, #tpu.memory_space<smem>>, %arg4: memref<4xi32, #tpu.memory_space<smem>>, %arg5: memref<4xi32, #tpu.memory_space<smem>>) -> (i32, i32, i32) {
    %c0_i32 = arith.constant 0 : i32
    %c0_i32_0 = arith.constant 0 : i32
    return %arg0, %arg1, %c0_i32 : i32, i32, i32
  }
}

</mosaic_0001>

<bundles_post_ra>
// kernel: tpu_custom_call.1
= control target key start
LH: loop header
LB: loop body
LE: loop exit
PB: predicated region body
PF: predicated region fallthrough
CT: control target
= control target key end

     0   :  { %s2762_s0 = inlined_call_operand.hbm [shape: s32[13], index: 0, kind: input, shape index: {}]   ;;  %s2763_s4 = inlined_call_operand.vmem [shape: f32[18], index: 4, kind: input, shape index: {}]   ;;  %s2764_s5 = inlined_call_operand.hbm [shape: f32[3,128,128], index: 5, kind: input, shape index: {}]   ;;  %s2765_s6 = inlined_call_operand.hbm [shape: f32[4,8,128], index: 6, kind: output, shape index: {}]   ;;  %s2766_s1 = inlined_call_operand.vmem [shape: s32[18], index: 1, kind: input, shape index: {}]   ;;  %s2767_s2 = inlined_call_operand.vmem [shape: s32[4], index: 2, kind: input, shape index: {}]   ;;  %s2768_s3 = inlined_call_operand.vmem [shape: s32[4], index: 3, kind: input, shape index: {}]  }
   0x1   :  { %2782 = sst [smem:[#allocation30_spill]] %s2763_s4  ;;  %s1821_s23 = scalar_lea.hbm %s2762_s0, 16 }
   0x2   :  { %2783 = sst [smem:[#allocation31_spill]] %s2764_s5  ;;  %p1822_p0 = scmp.ne.s32.totalorder %s2762_s0, %s1821_s23 }
   0x3   :  { %p1825_p1 = scmp.lt.u32.totalorder %s1821_s23, %s2762_s0 }
   0x5   :  { %p1827_p2 = pnand %p1825_p1, %p1822_p0 }
   0x7   :  { %1830 = shalt.err (!%p1827_p2)  }
   0x8   :  { %s2050_s28 = smov [#allocation4]   ;;  %s13_s9 = sshll.u32 %s2766_s1, 4  ;;  %s14_s9 = int_to_ptr.vmem [resolvable:$true] %s13_s9 }
   0x9   :  { %12 = dma.hbm_to_smem %s2762_s0, 16, %s2050_s28, [#allocation3] }
   0xa   :  { %s17_s12 = sshll.u32 %s2767_s2, 4  ;;  %s1831_s13 = scalar_lea.vmem %s14_s9, 16  ;;  %s18_s12 = int_to_ptr.vmem [resolvable:$true] %s17_s12 }
   0xb   :  { %p1832_p3 = scmp.ne.s32.totalorder %s14_s9, %s1831_s13  ;;  %p1836_p4 = scmp.lt.s32.totalorder %s14_s9, %s14_s9 }
   0xc   :  { %p1837_p5 = scmp.lt.s32.totalorder %s1831_s13, %s1831_s13 }
   0xe   :  { %p1838_p6 = por %p1837_p5, %p1836_p4 }
  0x10   :  { %p1839_p7 = pnand %p1838_p6, %p1832_p3 }
  0x12   :  { %1842 = shalt.err (!%p1839_p7)  }
  0x13   :  { %s2051_s14 = smov [#allocation5]   ;;  %s21_s16 = sshll.u32 %s2768_s3, 4  ;;  %s22_s16 = int_to_ptr.vmem [resolvable:$true] %s21_s16 }
  0x14   :  { %16 = dma.vmem_to_smem %s14_s9, 16, %s2051_s14, [#allocation3] }
  0x15   :  { %s1843_s1 = scalar_lea.vmem %s18_s12, 16  ;;  %p1848_p9 = scmp.lt.s32.totalorder %s18_s12, %s18_s12 }
  0x16   :  { %p1844_p8 = scmp.ne.s32.totalorder %s18_s12, %s1843_s1  ;;  %p1849_p10 = scmp.lt.s32.totalorder %s1843_s1, %s1843_s1 }
  0x18   :  { %p1850_p11 = por %p1849_p10, %p1848_p9 }
  0x1a   :  { %p1851_p12 = pnand %p1850_p11, %p1844_p8 }
  0x1c   :  { %1854 = shalt.err (!%p1851_p12)  }
  0x1d   :  { %s2052_s2 = smov [#allocation6]   ;;  %s1855_s17 = scalar_lea.vmem %s22_s16, 16 }
  0x1e   :  { %20 = dma.vmem_to_smem %s18_s12, 16, %s2052_s2, [#allocation3] }
  0x1f   :  { %p1856_p13 = scmp.ne.s32.totalorder %s22_s16, %s1855_s17  ;;  %p1860_p0 = scmp.lt.s32.totalorder %s22_s16, %s22_s16 }
  0x20   :  { %p1861_p1 = scmp.lt.s32.totalorder %s1855_s17, %s1855_s17 }
  0x22   :  { %p1862_p2 = por %p1861_p1, %p1860_p0 }
  0x24   :  { %p1863_p3 = pnand %p1862_p2, %p1856_p13 }
  0x26   :  { %1866 = shalt.err (!%p1863_p3)  }
  0x27   :  { %s2053_s18 = smov [#allocation7]  }
  0x28   :  { %24 = dma.vmem_to_smem %s22_s16, 16, %s2053_s18, [#allocation3] }
  0x29   :  { %1988 = dma.done.wait [#allocation3], 64 }
  0x2a   :  { %1989 = vsyncadd [#allocation3], 4294967232 }
  0x2b   :  { %26 = sfence }
  0x2c   :  { %27 = vsyncpa [#allocation11], 0 }
  0x2d   :  { %28 = vsyncpa [#allocation9], 0 }
  0x2e   :  { %30 = vsyncpa [#allocation9 + $0x1], 0 }
  0x2f   :  { %31 = vsyncpa [#allocation10], 0 }
  0x30   :  { %33 = vsyncpa [#allocation10 + $0x1], 0  ;;  %s2118_s3 = smov 0   ;;  %s2120_s19 = smov 0  }
  0x31   :  { %s2122_s20 = smov 0   ;;  %s2124_s21 = smov 0  }
  0x32   :  { %s2126_s22 = smov 0   ;;  %s2128_s23 = smov 0  }
  0x33   :  { %s2130_s24 = smov 0   ;;  %s2132_s25 = smov 0  }
  0x34   :  { %s2134_s26 = smov 0  }
  0x35 LB: > { %2784 = sst [smem:[#allocation20_spill]] %s2020_s22  ;;  %s1193_s27 = sadd.s32 4294967295, %s2036_s26   ;;  %s2036_s26 = sphi %s2134_s26, %s39_s26   ;;  %s2032_s25 = sphi %s2132_s25, %s2824_s25   ;;  %s2028_s24 = sphi %s2130_s24, %s2823_s24   ;;  %s2024_s23 = sphi %s2128_s23, %s2822_s23   ;;  %s2020_s22 = sphi %s2126_s22, %s2821_s22   ;;  %s2016_s21 = sphi %s2124_s21, %s2820_s21   ;;  %s2012_s20 = sphi %s2122_s20, %s2827_s20   ;;  %s2008_s19 = sphi %s2120_s19, %s2826_s19   ;;  %s2004_s3 = sphi %s2118_s3, %s2825_s3  }
  0x36   : > { %2785 = sst [smem:[#allocation21_spill]] %s2024_s23  ;;  %s1194_s28 = sadd.s32 4294967294, %s2036_s26  }
  0x37   : > { %2786 = sst [smem:[#allocation22_spill]] %s2032_s25  ;;  %p94_p4 = scmp.ne.s32.totalorder %s2020_s22, %s2016_s21 }
  0x38   : > { %p88_p5 = scmp.ne.s32.totalorder %s2024_s23, %s2020_s22  ;;  %p2166_p6 = scmp.eq.s32.totalorder %s1193_s27, 0 }
  0x39   : > { %p89_p7 = scmp.eq.s32.totalorder %s2036_s26, 0  ;;  %p119_p8 = scmp.ne.s32.totalorder %s2012_s20, %s2008_s19 }
  0x3a   : > { %s2787_s29 = scalar_select %p2166_p6, 1, 0 }
  0x3b   : > { %p2175_p9 = por %p2166_p6, %p94_p4  ;;  %p120_p10 = scmp.eq.s32.totalorder %s1193_s27, 3 }
  0x3c   : > { %p125_p11 = scmp.ne.s32.totalorder %s2008_s19, %s2004_s3  ;;  %p126_p12 = scmp.eq.s32.totalorder %s1194_s28, 3 }
  0x3d   : > { %s2788_s30 = scalar_select %p2175_p9, 1, 0 }
  0x3e   : > { %p2181_p13 = por %p120_p10, %p119_p8  ;;  %p1195_p0 = scmp.ge.s32.totalorder %s2036_s26, 1 }
  0x3f   : > { %p2186_p1 = por %p126_p12, %p125_p11  ;;  %p133_p2 = scmp.lt.s32.totalorder %s2036_s26, 5 }
  0x40   : > { %s2789_s7 = scalar_select %p2181_p13, 1, 0 }
  0x41   : > { %s2790_s8 = scalar_select %p2186_p1, 1, 0 }
  0x42   : > { %s2791_s4 = sld [smem:[#allocation30_spill]]  ;;  %p2197_p3 = por %p89_p7, %p88_p5 }
  0x43   : > { %p2201_p4 = pnand %p1195_p0, %p133_p2  ;;  %s51_s0 = sadd.s32 1, %s2032_s25 }
  0x44   : > { %p2214_p11 = scmp.ge.s32.totalorder %s51_s0, 4  ;;  %s76_s16 = sld [smem:[#allocation6 + %s2032_s25]] }
  0x45   : > { %p1697_p8 = pneg %p2201_p4  ;;  %s2770_s1 = sand.u32 1, %s2024_s23  }
  0x47   : > { %p2209_p10 = pnand %p1697_p8, %p2166_p6 }
  0x48   : > { %s146_s11 = sshll.u32 %s2791_s4, 4  ;;  %s147_s11 = int_to_ptr.vmem [resolvable:$true] %s146_s11 }
  0x49   : > { %s1867_s2 = scalar_lea.vmem %s147_s11, 16  ;;  %p1869_p7 = pneg %p2209_p10 }
  0x4a   : > { %p1868_p5 = scmp.ne.s32.totalorder %s147_s11, %s1867_s2  ;;  %p1875_p2 = scmp.lt.s32.totalorder %s147_s11, %s147_s11 }
  0x4b   : > { %p1876_p1 = scmp.lt.s32.totalorder %s1867_s2, %s1867_s2 }
  0x4c   : > { %p1870_p12 = pnand %p1869_p7, %p1868_p5 }
  0x4d   : > { %p1877_p8 = por %p1876_p1, %p1875_p2 }
  0x4e   : > { %p1871_p0 = pneg %p1870_p12 }
  0x50   : > { %p1878_p13 = pnand %p1877_p8, %p1871_p0 }
  0x52   : > { %1881 = shalt.err (!%p1878_p13)
}
  0x53   : > { %s2054_s17 = smov [#allocation8]   ;;  %s2829_s0 = smov (%p2214_p11, %s51_s0), 0 }
  0x54   : > { %1700 = dma.vmem_to_smem (!%p2209_p10), %s147_s11, 16, %s2054_s17, [#allocation11]  }
  0x55   : > { %2796 = sst [smem:[#allocation23_spill]] %s2829_s0  ;;  %s109_s18 = sadd.s32 1, %s2012_s20 }
  0x56   : > { %p1712_p13 = scmp.lt.s32.totalorder %s2036_s26, 4  ;;  %s77_s21 = sld [smem:[#allocation6 + %s2829_s0]] }
  0x57   : > { %s104_s27 = ssub.s32 %s2032_s25, %s2829_s0  ;;  %s1198_s28 = sshll.u32 %s2770_s1, 7 }
  0x58   : > { %p107_p1 = scmp.eq.s32.totalorder %s104_s27, 0  ;;  %s81_s14 = sadd.s32 1, %s2024_s23 }
  0x59   : > { %s1689_s9 = scalar_select %p2197_p3, [#allocation6], [#allocation14] }
  0x5a   : > { %s2238_s10 = scalar_select %p107_p1, %s2012_s20, %s109_s18  }
  0x5b   : > { %s1690_s11 = scalar_select %p2197_p3, %s2032_s25, 0 }
  0x5c   : > { %s2831_s9 = smov (!%p1712_p13, %s1689_s9), [#allocation15]  ;;  %s78_s15 = ssub.s32 %s76_s16, %s77_s21 }
  0x5d   : > { %p79_p10 = scmp.eq.s32.totalorder %s78_s15, 0  ;;  %s2833_s11 = smov (!%p1712_p13, %s1690_s11), 0 }
  0x5e   : > { %s162_s17 = sld [smem:[%s2831_s9 + %s2833_s11]]  ;;  %p2255_p11 = pnand %p1712_p13, %p2197_p3 }
  0x5f   : > { %s2249_s2 = scalar_select %p79_p10, %s2024_s23, %s81_s14  }
  0x60   : > { %s161_s18 = scalar_lea.vmem [#allocation12], %s1198_s28  ;;  %s2799_s5 = sld [smem:[#allocation31_spill]] }
  0x61   : > { %2797 = sst [smem:[#allocation24_spill]] %s2249_s2  ;;  %s169_s1 = sshll.u32 %s161_s18, 4  ;;  %s2259_s1 = int_to_ptr.vmem [resolvable:$true] %s169_s1 }
  0x62   : > { %s2800_s14 = sand.u32 1, %s2024_s23   ;;  %p1884_p5 = pneg %p2255_p11 }
  0x63   : > { %s2268_s12 = scalar_lea.sflag [#allocation9], %s2800_s14 }
  0x64   : > { %s1216_s4 = sshll.u32 %s162_s17, 11 }
  0x66   : > { %s2264_s15 = scalar_lea.hbm %s2799_s5, %s1216_s4  ;;  %s1887_s4 = scalar_lea.hbm %s2799_s5, 6144 }
  0x67   : > { %s1882_s9 = scalar_lea.hbm %s2264_s15, 2048  ;;  %p1888_p0 = scmp.lt.u32.totalorder %s2264_s15, %s2799_s5 }
  0x68   : > { %p1883_p3 = scmp.ne.s32.totalorder %s2264_s15, %s1882_s9  ;;  %p1889_p2 = scmp.lt.u32.totalorder %s1887_s4, %s1882_s9 }
  0x69   : > { %p1891_p13 = scmp.lt.u32.totalorder %s1882_s9, %s2264_s15 }
  0x6a   : > { %p1885_p7 = pnand %p1884_p5, %p1883_p3  ;;  %p1890_p8 = por %p1889_p2, %p1888_p0 }
  0x6c   : > { %p1886_p12 = pneg %p1885_p7  ;;  %p1892_p1 = por %p1891_p13, %p1890_p8 }
  0x6e   : > { %p1893_p10 = pnand %p1892_p1, %p1886_p12 }
  0x70   : > { %1896 = shalt.err (!%p1893_p10)
}
  0x71   : > { %s1897_s16 = scalar_lea.vmem %s2259_s1, 2048  ;;  %s2055_s21 = smov [#allocation12]  }
  0x72   : > { %p1898_p3 = scmp.ne.s32.totalorder %s2259_s1, %s1897_s16  ;;  %s1902_s14 = sshll.u32 %s2055_s21, 4  ;;  %s1903_s14 = int_to_ptr.vmem [resolvable:$false] %s1902_s14 }
  0x73   : > { %s1904_s28 = scalar_lea.vmem %s1903_s14, 4096  ;;  %p1905_p6 = scmp.lt.s32.totalorder %s2259_s1, %s1903_s14 }
  0x74   : > { %p1900_p7 = pnand %p1898_p3, %p1884_p5  ;;  %p1906_p0 = scmp.lt.s32.totalorder %s1904_s28, %s1897_s16 }
  0x76   : > { %p1901_p9 = pneg %p1900_p7  ;;  %p1907_p2 = por %p1906_p0, %p1905_p6 }
  0x78   : > { %p1908_p8 = pnand %p1907_p2, %p1901_p9 }
  0x7a   : > { %1911 = shalt.err (!%p1908_p8)
}
  0x7b   : > { %s2056_s9 = smov 128   ;;  %s2057_s11 = smov 8  }
  0x7c   : > { %1706 = dma.hbm_to_vmem [thread:$0]  (!%p2255_p11), %s2264_s15, 2048, %s2259_s1, %s2268_s12, %s2056_s9, %s2056_s9, %s2057_s11  }
  0x7d   : > { %181 = sbr.rel (%p2201_p4) target bundleno = 550 (0x226), region = 28 }
  0x84   : > { %p2801_p5 = scmp.ne.s32.totalorder %s2787_s29, 0 }
  0x86   : > { %1991 = dma.done.wait (%p2801_p5), [#allocation11], 16  }
  0x87   : > { %1993 = vsyncadd (%p2801_p5), [#allocation11], 4294967280  ;;  %s187_s4 = sand.u32 1, %s2020_s22   ;;  %p2802_p6 = scmp.ne.s32.totalorder %s2788_s30, 0 }
  0x88   : > { %s1203_s17 = sshll.u32 %s187_s4, 7  ;;  %s188_s18 = scalar_lea.sflag [#allocation9], %s187_s4 }
  0x89   : > { %s2303_s16 = scalar_lea.vmem [#allocation12], %s1203_s17 }
  0x8a   : > { %1995 = dma.done.wait (%p2802_p6), %s188_s18, 2048  }
  0x8b   : > { %1997 = vsyncadd (%p2802_p6), %s188_s18, 4294965248 }
  0x8c   : > { %196 = sfence }
  0x8d   : > { %s2774_s13 = sand.u32 1, %s2008_s19   ;;  %s214_s1 = sld [smem:[#allocation7 + %s2028_s24]]  ;;  %v216_v0 = vlaneseq  ;;  %v2364_v13 = vmov 0.0  }
  0x8e   : > { %s2313_s29 = sshll.u32 %s2774_s13, 3 }
  0x8f   : > { %v2315_v1 = vand.u32 127, %v216_v0  ;;  %v2323_v2 = vshrl.u32 %v216_v0, 7 }
  0x91   : > { %vm220_vm0 = vcmp.eq.s32.totalorder %v2323_v2, 1  ;;  %vm221_vm1 = vcmp.eq.s32.totalorder %v2323_v2, 2  ;;  %vm222_vm2 = vcmp.eq.s32.totalorder %v2323_v2, 3  ;;  %vm223_vm3 = vcmp.eq.s32.totalorder %v2323_v2, 4 }
  0x92   : > { %vm224_vm4 = vcmp.eq.s32.totalorder %v2323_v2, 5  ;;  %vm225_vm5 = vcmp.eq.s32.totalorder %v2323_v2, 6  ;;  %vm226_vm6 = vcmp.eq.s32.totalorder %v2323_v2, 7 }
  0x93   : > { %s215_s27 = smul.u32 3, %s214_s1 }
  0x95   : > { %s2317_s15 = sld [smem:[#allocation4 + %s215_s27]]  ;;  %s233_s12 = sadd.s32 1, %s215_s27 }
  0x96   : > { %s234_s21 = sld [smem:[#allocation4 + %s233_s12]]  ;;  %s243_s14 = sadd.s32 1, %s233_s12 }
  0x97   : > { %s2319_s30 = sld [smem:[#allocation4 + %s233_s12]]  ;;  %s251_s28 = sadd.s32 2, %s215_s27 }
  0x98   : > { %s244_s9 = sld [smem:[#allocation4 + %s243_s14]]  ;;  %s253_s4 = sadd.s32 1, %s251_s28 }
  0x99   : > { %s2321_s11 = sld [smem:[#allocation4 + %s251_s28]] }
  0x9a   : > { %s2325_s17 = sld [smem:[#allocation4 + %s251_s28]] }
  0x9b   : > { %2803 = sst [smem:[#allocation25_spill]] %s2317_s15 }
  0x9c   : > { %s254_s18 = sld [smem:[#allocation4 + %s253_s4]]  ;;  %s235_s0 = ssub.s32 %s234_s21, %s2317_s15 }
  0x9d   : > { %2804 = sst [smem:[#allocation26_spill]] %s2319_s30  ;;  %v307_v3 = vstv %s235_s0 }
  0x9e   : > { %s2327_s1 = sld [smem:[#allocation4 + %s251_s28]]  ;;  %s245_s27 = ssub.s32 %s244_s9, %s2319_s30 }
  0x9f   : > { %2805 = sst [smem:[#allocation27_spill]] %s2321_s11  ;;  %v308_v4 = vstv %s245_s27  ;;  %p322_p9 = scmp.gt.s32.totalorder %s235_s0, %s245_s27 }
  0xa0   : > { %2806 = sst [smem:[#allocation28_spill]] %s2325_s17  ;;  %v309_v5 = vsel %vm220_vm0, %v308_v4, %v307_v3 }
  0xa1   : > { %s2329_s13 = sld [smem:[#allocation4 + %s251_s28]]  ;;  %s2835_s0 = smov (!%p322_p9, %s235_s0), %s245_s27 }
  0xa2   : > { %s2331_s5 = sld [smem:[#allocation4 + %s251_s28]]  ;;  %s255_s12 = ssub.s32 %s254_s18, %s2321_s11 }
  0xa3   : > { %s2334_s25 = sld [smem:[#allocation4 + %s251_s28]]  ;;  %v310_v6 = vstv %s255_s12  ;;  %p324_p4 = scmp.gt.s32.totalorder %s2835_s0, %s255_s12 }
  0xa4   : > { %2807 = sst [smem:[#allocation29_spill]] %s2327_s1  ;;  %v311_v7 = vsel %vm221_vm1, %v310_v6, %v309_v5 }
  0xa5   : > { %v313_v8 = vsel %vm222_vm2, 0, %v311_v7  ;;  %s2837_s0 = smov (!%p324_p4, %s2835_s0), %s255_s12 }
  0xa6   : > { %v315_v9 = vsel %vm223_vm3, 0, %v313_v8  ;;  %p326_p11 = scmp.gt.s32.totalorder %s2837_s0, 0 }
  0xa7   : > { %v317_v10 = vsel %vm224_vm4, 0, %v315_v9 }
  0xa8   : > { %v319_v11 = vsel %vm225_vm5, 0, %v317_v10  ;;  %s2839_s0 = smov (!%p326_p11, %s2837_s0), 0 }
  0xa9   : > { %v2359_v12 = vsel %vm226_vm6, 0, %v319_v11  ;;  %s2841_s0 = smov (!%p326_p11, %s2839_s0), 0 }
  0xaa   : > { %p330_p12 = scmp.gt.s32.totalorder %s2841_s0, 0 }
  0xac   : > { %s2843_s0 = smov (!%p330_p12, %s2841_s0), 0 }
  0xad   : > { %s2845_s0 = smov (!%p330_p12, %s2843_s0), 0 }
  0xae   : > { %p334_p13 = scmp.gt.s32.totalorder %s2845_s0, 0  ;;  %p1217_p1 = scmp.le.s32.totalorder %s2845_s0, 0 }
  0xaf   : > { %v2366_v14 = vmov (!%p1217_p1), 0.0   ;;  %s2368_s28 = smov (!%p1217_p1), 0  }
  0xb0   : > { %s2361_s21 = scalar_select %p334_p13, %s2845_s0, 0 }
  0xb1   : > { %1147 = sbr.rel (%p1217_p1) target bundleno = 222 (0xde), region = 79 }
  0xb8 LB: >> { %s2808_s15 = sld [smem:[#allocation25_spill]]  ;;  %s2809_s30 = sld [smem:[#allocation26_spill]]  ;;  %v413_v35 = vstv %s2044_s28  ;;  %s2044_s28 = sphi %s2368_s28, %s339_s28   ;;  %v2040_v14 = vphi %v2366_v14, %v2813_v14  }
  0xb9   : >> { %s2810_s11 = sld [smem:[#allocation27_spill]]  ;;  %s2811_s17 = sld [smem:[#allocation28_spill]]  ;;  %vm414_vm7 = vcmp.lt.s32.totalorder %v413_v35, %v2359_v12 }
  0xba   : >> { %s2812_s1 = sld [smem:[#allocation29_spill]]  ;;  %s368_s22 = sadd.s32 %s2044_s28, %s2329_s13 }
  0xbb   : >> { %p369_p8 = scmp.lt.s32.totalorder %s368_s22, 17 }
  0xbd   : >> { %s2857_s22 = smov (!%p369_p8, %s368_s22), 17 }
  0xbe   : >> { %s343_s0 = sadd.s32 %s2044_s28, %s2808_s15  ;;  %s348_s9 = sadd.s32 %s2044_s28, %s2809_s30 }
  0xbf   : >> { %p344_p10 = scmp.lt.s32.totalorder %s343_s0, 17  ;;  %p349_p3 = scmp.lt.s32.totalorder %s348_s9, 17 }
  0xc0   : >> { %s353_s4 = sadd.s32 %s2044_s28, %s2810_s11  ;;  %s358_s18 = sadd.s32 %s2044_s28, %s2811_s17 }
  0xc1   : >> { %s2847_s0 = smov (!%p344_p10, %s343_s0), 17  ;;  %s2849_s9 = smov (!%p349_p3, %s348_s9), 17 }
  0xc2   : >> { %s346_s27 = sld [smem:[#allocation5 + %s2847_s0]]  ;;  %p354_p7 = scmp.lt.s32.totalorder %s353_s4, 17 }
  0xc3   : >> { %s347_s12 = sld [smem:[#allocation8 + %s2847_s0]]  ;;  %p359_p0 = scmp.lt.s32.totalorder %s358_s18, 17 }
  0xc4   : >> { %s351_s14 = sld [smem:[#allocation5 + %s2849_s9]]  ;;  %s363_s23 = sadd.s32 %s2044_s28, %s2812_s1 }
  0xc5   : >> { %s352_s2 = sld [smem:[#allocation8 + %s2849_s9]]  ;;  %s2851_s4 = smov (!%p354_p7, %s353_s4), 17 }
  0xc6   : >> { %s2853_s18 = smov (!%p359_p0, %s358_s18), 17  ;;  %s356_s15 = sld [smem:[#allocation5 + %s2851_s4]] }
  0xc7   : >> { %s357_s30 = sld [smem:[#allocation8 + %s2851_s4]]  ;;  %p364_p2 = scmp.lt.s32.totalorder %s363_s23, 17 }
  0xc8   : >> { %s361_s11 = sld [smem:[#allocation5 + %s2853_s18]]  ;;  %v383_v15 = vstv %s346_s27  ;;  %s373_s0 = sadd.s32 %s2044_s28, %s2331_s5 }
  0xc9   : >> { %s362_s17 = sld [smem:[#allocation8 + %s2853_s18]]  ;;  %v398_v17 = vstv %s347_s12  ;;  %s378_s9 = sadd.s32 %s2044_s28, %s2334_s25 }
  0xca   : >> { %v384_v16 = vstv %s351_s14  ;;  %s2855_s23 = smov (!%p364_p2, %s363_s23), 17  ;;  %s371_s18 = sld [smem:[#allocation5 + %s2857_s22]] }
  0xcb   : >> { %v399_v18 = vstv %s352_s2  ;;  %v385_v19 = vsel %vm220_vm0, %v384_v16, %v383_v15  ;;  %s366_s1 = sld [smem:[#allocation5 + %s2855_s23]]  ;;  %p374_p5 = scmp.lt.s32.totalorder %s373_s0, 17 }
  0xcc   : >> { %v400_v20 = vsel %vm220_vm0, %v399_v18, %v398_v17  ;;  %s367_s4 = sld [smem:[#allocation8 + %s2855_s23]]  ;;  %v386_v21 = vstv %s356_s15  ;;  %p379_p6 = scmp.lt.s32.totalorder %s378_s9, 17 }
  0xcd   : >> { %v401_v22 = vstv %s357_s30  ;;  %s372_s14 = sld [smem:[#allocation8 + %s2857_s22]]  ;;  %v387_v23 = vsel %vm221_vm1, %v386_v21, %v385_v19  ;;  %s2859_s0 = smov (!%p374_p5, %s373_s0), 17 }
  0xce   : >> { %v388_v24 = vstv %s361_s11  ;;  %v402_v25 = vsel %vm221_vm1, %v401_v22, %v400_v20  ;;  %s2861_s9 = smov (!%p379_p6, %s378_s9), 17  ;;  %s376_s22 = sld [smem:[#allocation5 + %s2859_s0]] }
  0xcf   : >> { %v403_v26 = vstv %s362_s17  ;;  %v389_v27 = vsel %vm222_vm2, %v388_v24, %v387_v23  ;;  %s377_s23 = sld [smem:[#allocation8 + %s2859_s0]]  ;;  %s339_s28 = sadd.s32 1, %s2044_s28  }
  0xd0   : >> { %v404_v28 = vsel %vm222_vm2, %v403_v26, %v402_v25  ;;  %s381_s2 = sld [smem:[#allocation5 + %s2861_s9]]  ;;  %v392_v32 = vstv %s371_s18  ;;  %p338_p9 = scmp.ge.s32.totalorder %s339_s28, %s2361_s21 }
  0xd1   : >> { %v390_v29 = vstv %s366_s1  ;;  %s382_s15 = sld [smem:[#allocation8 + %s2861_s9]] }
  0xd2   : >> { %v405_v30 = vstv %s367_s4  ;;  %v391_v31 = vsel %vm223_vm3, %v390_v29, %v389_v27 }
  0xd3   : >> { %v406_v33 = vsel %vm223_vm3, %v405_v30, %v404_v28  ;;  %v407_v34 = vstv %s372_s14  ;;  %v393_v36 = vsel %vm224_vm4, %v392_v32, %v391_v31 }
  0xd4   : >> { %v408_v37 = vsel %vm224_vm4, %v407_v34, %v406_v33  ;;  %v394_v38 = vstv %s376_s22 }
  0xd5   : >> { %v409_v39 = vstv %s377_s23  ;;  %v395_v40 = vsel %vm225_vm5, %v394_v38, %v393_v36 }
  0xd6   : >> { %v396_v41 = vstv %s381_s2  ;;  %v410_v42 = vsel %vm225_vm5, %v409_v39, %v408_v37 }
  0xd7   : >> { %v411_v43 = vstv %s382_s15  ;;  %v397_v44 = vsel %vm226_vm6, %v396_v41, %v395_v40  ;;  %341 = sbr.rel (!%p338_p9) target bundleno = 184 (0xb8), region = 85 }
  0xd8   : >> { %v412_v45 = vsel %vm226_vm6, %v411_v43, %v410_v42  ;;  %vm416_vm8 = vcmp.eq.s32.totalorder %v2315_v1, %v397_v44 }
  0xd9   : >> { %v415_v46 = vsel %vm414_vm7, %v412_v45, 0.0 }
  0xda   : >> { %v417_v47 = vsel %vm416_vm8, %v415_v46, 0.0 }
  0xdb   : >> { %v418_v48 = vadd.f32 %v2040_v14, %v417_v47  }
  0xdd   : >> { %v2813_v14 = vmov %v418_v48  ;;  %v2814_v13 = vmov (%p338_p9), %v418_v48 }
  0xde PF: > { %v421_v49 = vld [vmem:[%s2303_s16] sm:$0xff]  ;;  %v422_v50 = vld [vmem:[%s2303_s16 + $0x8] sm:$0xff]  ;;  %v423_v51 = vld [vmem:[%s2303_s16 + $0x10] sm:$0xff]  ;;  %v2058_v52 = vmov 0.0|0.0   ;;  %vm2059_vm9 = vmmov 0   ;;  %v2060_v60 = vmov 0.0   ;;  %v2048_v13 = vphi %v2364_v13, %v2814_v13  }
  0xdf   : > { %1534 = vmatprep.subr.bf16.mxu1 %v2058_v52  ;;  %1606 = vmatprep.subr.bf16.mxu0 %v2058_v52  ;;  %v438_v53 = vand.u32 4294901760, %v421_v49  ;;  %v441_v54 = vand.u32 4294901760, %v422_v50  ;;  %v424_v55 = vld [vmem:[%s2303_s16 + $0x18] sm:$0xff]  ;;  %v444_v56 = vand.u32 4294901760, %v423_v51  ;;  %v425_v58 = vld [vmem:[%s2303_s16 + $0x20] sm:$0xff]  ;;  %v426_v59 = vld [vmem:[%s2303_s16 + $0x28] sm:$0xff] }
  0xe0   : > { %v447_v57 = vand.u32 4294901760, %v424_v55  ;;  %1356 = vmatprep.mubr.msk.f32.mxu1 %vm2059_vm9, %v2060_v60  ;;  %1461 = vmatprep.mubr.msk.f32.mxu0 %vm2059_vm9, %v2060_v60  ;;  %v450_v63 = vand.u32 4294901760, %v425_v58  ;;  %v453_v0 = vand.u32 4294901760, %v426_v59  ;;  %v427_v1 = vld [vmem:[%s2303_s16 + $0x30] sm:$0xff]  ;;  %v428_v2 = vld [vmem:[%s2303_s16 + $0x38] sm:$0xff]  ;;  %v2462_v6 = vld [vmem:[%s2303_s16 + $0x40] sm:$0xff] }
  0xe1   : > { %v2445_v61 = vpack.c.bf16 %v441_v54, %v438_v53  ;;  %v456_v4 = vand.u32 4294901760, %v427_v1  ;;  %v459_v5 = vand.u32 4294901760, %v428_v2  ;;  %v2465_v7 = vld [vmem:[%s2303_s16 + $0x48] sm:$0xff]  ;;  %v462_v9 = vand.u32 4294901760, %v2462_v6  ;;  %v2476_v11 = vld [vmem:[%s2303_s16 + $0x50] sm:$0xff]  ;;  %v2479_v12 = vld [vmem:[%s2303_s16 + $0x58] sm:$0xff] }
  0xe2   : > { %v2449_v62 = vpack.c.bf16 %v447_v57, %v444_v56  ;;  %v2457_v3 = vpack.c.bf16 %v453_v0, %v450_v63  ;;  %v465_v10 = vand.u32 4294901760, %v2465_v7  ;;  %v2481_v14 = vsub.f32 %v421_v49, %v438_v53  ;;  %v2494_v20 = vld [vmem:[%s2303_s16 + $0x60] sm:$0xff]  ;;  %v2499_v21 = vld [vmem:[%s2303_s16 + $0x68] sm:$0xff]  ;;  %v2519_v28 = vld [vmem:[%s2303_s16 + $0x70] sm:$0xff]  ;;  %s1213_s5 = sshll.u32 %s2028_s24, 7  ;;  %s2815_s25 = scalar_lea.vmem [#allocation13], %s2313_s29 }
  0xe3   : > { %1536 = vmatpush3.bf16.msra.mxu1 %v2445_v61  ;;  %1608 = vmatpush3.bf16.msra.mxu0 %v2445_v61  ;;  %v2469_v8 = vpack.c.bf16 %v459_v5, %v456_v4  ;;  %v2483_v15 = vand.u32 4294901760, %v2048_v13  ;;  %v2485_v16 = vsub.f32 %v422_v50, %v441_v54  ;;  %v468_v18 = vand.u32 4294901760, %v2476_v11  ;;  %v2522_v29 = vld [vmem:[%s2303_s16 + $0x78] sm:$0xff]  ;;  %s1094_s16 = sshll.u32 %s2815_s25, 4  ;;  %s2702_s11 = scalar_lea.hbm %s2765_s6, %s1213_s5  ;;  %s2704_s16 = int_to_ptr.vmem [resolvable:$true] %s1094_s16 }
  0xe4   : > { %1537 = vmatprep.subr.bf16.mxu1 %v2058_v52  ;;  %1609 = vmatprep.subr.bf16.mxu0 %v2058_v52  ;;  %v2489_v17 = vpack.c.bf16 %v465_v10, %v462_v9  ;;  %v471_v19 = vand.u32 4294901760, %v2479_v12  ;;  %v2501_v22 = vsub.f32 %v423_v51, %v444_v56  ;;  %v2503_v23 = vsub.f32 %v424_v55, %v447_v57  ;;  %s2816_s17 = smov %s2815_s25  ;;  %s2817_s24 = sand.u32 1, %s2008_s19  }
  0xe5   : > { %v474_v24 = vand.u32 4294901760, %v2494_v20  ;;  %v2507_v25 = vsub.f32 %v2048_v13, %v2483_v15  ;;  %v477_v27 = vand.u32 4294901760, %v2499_v21  ;;  %v531_v30 = vand.u32 4294901760, %v2481_v14  ;;  %s1080_s1 = scalar_lea.sflag [#allocation10], %s2817_s24  ;;  %s1912_s21 = scalar_lea.vmem %s2704_s16, 128 }
  0xe6   : > { %v2515_v26 = vpack.c.bf16 %v471_v19, %v468_v18  ;;  %v538_v13 = vand.u32 4294901760, %v2485_v16  ;;  %v2528_v31 = vsub.f32 %v425_v58, %v450_v63  ;;  %v2530_v32 = vsub.f32 %v426_v59, %v453_v0  ;;  %p1913_p4 = scmp.ne.s32.totalorder %s2704_s16, %s1912_s21  ;;  %p2818_p11 = scmp.ne.s32.totalorder %s2789_s7, 0 }
  0xe7   : > { %1539 = vmatpush3.bf16.msra.mxu1 %v2449_v62  ;;  %1611 = vmatpush3.bf16.msra.mxu0 %v2449_v62  ;;  %v480_v33 = vand.u32 4294901760, %v2519_v28  ;;  %v483_v34 = vand.u32 4294901760, %v2522_v29  ;;  %v520_v35 = vand.u32 4294901760, %v2507_v25  ;;  %v545_v36 = vand.u32 4294901760, %v2501_v22  ;;  %s2061_s28 = smov [#allocation13]  }
  0xe8   : > { %1540 = vmatprep.subr.bf16.mxu1 %v2058_v52  ;;  %1612 = vmatprep.subr.bf16.mxu0 %v2058_v52  ;;  %v2542_v37 = vpack.c.bf16 %v477_v27, %v474_v24  ;;  %v532_v38 = vsub.f32 %v2481_v14, %v531_v30  ;;  %v539_v39 = vsub.f32 %v2485_v16, %v538_v13  ;;  %v552_v40 = vand.u32 4294901760, %v2503_v23  ;;  %p1914_p12 = pnand %p1913_p4, %p2818_p11  ;;  %s1916_s27 = sshll.u32 %s2061_s28, 4  ;;  %s1917_s27 = int_to_ptr.vmem [resolvable:$false] %s1916_s27 }
  0xe9   : > { %v2549_v41 = vsub.f32 %v427_v1, %v456_v4  ;;  %v2551_v42 = vsub.f32 %v428_v2, %v459_v5  ;;  %v521_v43 = vsub.f32 %v2507_v25, %v520_v35  ;;  %v546_v44 = vsub.f32 %v2501_v22, %v545_v36  ;;  %s1918_s12 = scalar_lea.vmem %s1917_s27, 256  ;;  %p1919_p1 = scmp.lt.s32.totalorder %s2704_s16, %s1917_s27 }
  0xea   : > { %v559_v45 = vand.u32 4294901760, %v2528_v31  ;;  %v566_v46 = vand.u32 4294901760, %v2530_v32  ;;  %v2563_v47 = vpack.c.bf16 %v483_v34, %v480_v33  ;;  %v533_v48 = vand.u32 4294901760, %v532_v38  ;;  %p1915_p13 = pneg %p1914_p12  ;;  %p1920_p10 = scmp.lt.s32.totalorder %s1918_s12, %s1912_s21 }
  0xeb   : > { %1542 = vmatpush3.bf16.msra.mxu1 %v2457_v3  ;;  %1614 = vmatpush3.bf16.msra.mxu0 %v2457_v3  ;;  %v540_v49 = vand.u32 4294901760, %v539_v39  ;;  %v553_v50 = vsub.f32 %v2503_v23, %v552_v40  ;;  %v2569_v51 = vsub.f32 %v2462_v6, %v462_v9  ;;  %v2572_v53 = vsub.f32 %v2465_v7, %v465_v10 }
  0xec   : > { %1543 = vmatprep.subr.bf16.mxu1 %v2058_v52  ;;  %1615 = vmatprep.subr.bf16.mxu0 %v2058_v52  ;;  %v1631_v54 = vpack.c.bf16 %v538_v13, %v531_v30  ;;  %v522_v55 = vand.u32 4294901760, %v521_v43  ;;  %v547_v56 = vand.u32 4294901760, %v546_v44  ;;  %v560_v57 = vsub.f32 %v2528_v31, %v559_v45  ;;  %p1921_p3 = por %p1920_p10, %p1919_p1 }
  0xed   : > { %v567_v58 = vsub.f32 %v2530_v32, %v566_v46  ;;  %v1559_v59 = vpack.c.bf16 %v540_v49, %v533_v48  ;;  %v554_v63 = vand.u32 4294901760, %v553_v50  ;;  %v573_v0 = vand.u32 4294901760, %v2549_v41 }
  0xee   : > { %v580_v1 = vand.u32 4294901760, %v2551_v42  ;;  %v2585_v2 = vsub.f32 %v2476_v11, %v468_v18  ;;  %v2590_v4 = vsub.f32 %v2479_v12, %v471_v19  ;;  %v1634_v5 = vpack.c.bf16 %v552_v40, %v545_v36  ;;  %p1922_p7 = pnand %p1921_p3, %p1915_p13 }
  0xef   : > { %1545 = vmatpush3.bf16.msra.mxu1 %v2469_v8  ;;  %1617 = vmatpush3.bf16.msra.mxu0 %v2469_v8  ;;  %v561_v6 = vand.u32 4294901760, %v560_v57  ;;  %v568_v7 = vand.u32 4294901760, %v567_v58  ;;  %v587_v9 = vand.u32 4294901760, %v2569_v51  ;;  %v1562_v10 = vpack.c.bf16 %v554_v63, %v547_v56 }
  0xf0   : > { %1546 = vmatprep.subr.bf16.mxu1 %v2058_v52  ;;  %1618 = vmatprep.subr.bf16.mxu0 %v2058_v52  ;;  %v574_v30 = vsub.f32 %v2549_v41, %v573_v0  ;;  %v581_v11 = vsub.f32 %v2551_v42, %v580_v1  ;;  %v594_v18 = vand.u32 4294901760, %v2572_v53  ;;  %v2601_v12 = vsub.f32 %v2494_v20, %v474_v24 }
  0xf1   : > { %v2606_v19 = vsub.f32 %v2499_v21, %v477_v27  ;;  %v1565_v13 = vpack.c.bf16 %v568_v7, %v561_v6  ;;  %v588_v36 = vsub.f32 %v2569_v51, %v587_v9  ;;  %v601_v38 = vand.u32 4294901760, %v2585_v2 }
  0xf2   : > { %v575_v20 = vand.u32 4294901760, %v574_v30  ;;  %v582_v24 = vand.u32 4294901760, %v581_v11  ;;  %v595_v39 = vsub.f32 %v2572_v53, %v594_v18  ;;  %v608_v21 = vand.u32 4294901760, %v2590_v4 }
  0xf3   : > { %1548 = vmatpush3.bf16.msra.mxu1 %v2489_v17  ;;  %1620 = vmatpush3.bf16.msra.mxu0 %v2489_v17  ;;  %v2621_v27 = vsub.f32 %v2519_v28, %v480_v33  ;;  %v2626_v40 = vsub.f32 %v2522_v29, %v483_v34  ;;  %v1640_v43 = vpack.c.bf16 %v580_v1, %v573_v0  ;;  %v589_v44 = vand.u32 4294901760, %v588_v36 }
  0xf4   : > { %1549 = vmatprep.subr.bf16.mxu1 %v2058_v52  ;;  %1621 = vmatprep.subr.bf16.mxu0 %v2058_v52  ;;  %v1568_v48 = vpack.c.bf16 %v582_v24, %v575_v20  ;;  %v596_v49 = vand.u32 4294901760, %v595_v39  ;;  %v609_v50 = vsub.f32 %v2590_v4, %v608_v21  ;;  %v622_v28 = vand.u32 4294901760, %v2606_v19 }
  0xf5   : > { %v1643_v29 = vpack.c.bf16 %v594_v18, %v587_v9  ;;  %v636_v58 = vand.u32 4294901760, %v2626_v40 }
  0xf6   : > { %v610_v56 = vand.u32 4294901760, %v609_v50  ;;  %v623_v57 = vsub.f32 %v2606_v19, %v622_v28 }
  0xf7   : > { %1551 = vmatpush3.bf16.msra.mxu1 %v2515_v26  ;;  %1623 = vmatpush3.bf16.msra.mxu0 %v2515_v26  ;;  %v637_v6 = vsub.f32 %v2626_v40, %v636_v58 }
  0xf8   : > { %1552 = vmatprep.subr.bf16.mxu1 %v2058_v52  ;;  %1624 = vmatprep.subr.bf16.mxu0 %v2058_v52  ;;  %v624_v1 = vand.u32 4294901760, %v623_v57 }
  0xf9   : > { %v638_v30 = vand.u32 4294901760, %v637_v6 }
  0xfb   : > { %1554 = vmatpush3.bf16.msra.mxu1 %v2542_v37  ;;  %1626 = vmatpush3.bf16.msra.mxu0 %v2542_v37 }
  0xfc   : > { %1555 = vmatprep.subr.bf16.mxu1 %v2058_v52  ;;  %1627 = vmatprep.subr.bf16.mxu0 %v2058_v52 }
  0xff   : > { %1557 = vmatpush3.bf16.msra.mxu1 %v2563_v47  ;;  %1629 = vmatpush3.bf16.msra.mxu0 %v2563_v47 }
 0x100   : > { %1558 = vmatprep.subr.bf16.mxu1 %v2058_v52  ;;  %1630 = vmatprep.subr.bf16.mxu0 %v2058_v52 }
 0x102   : > { %1357 = vmatmul.mubr.f32.vlgmr.msra.gmra.mrb[0].mxu1 %v522_v55  ;;  %1462 = vmatmul.mubr.f32.vlgmr.msra.gmra.mrb[0].mxu0 %v520_v35  ;;  %v1637_v35 = vpack.c.bf16 %v566_v46, %v559_v45  ;;  %v602_v45 = vsub.f32 %v2585_v2, %v601_v38  ;;  %v615_v46 = vand.u32 4294901760, %v2601_v12  ;;  %v1571_v55 = vpack.c.bf16 %v596_v49, %v589_v44 }
 0x103   : > { %1560 = vmatpush3.bf16.msra.mxu1 %v1559_v59  ;;  %1632 = vmatpush3.bf16.msra.mxu0 %v1631_v54  ;;  %v629_v54 = vand.u32 4294901760, %v2621_v27  ;;  %v1646_v59 = vpack.c.bf16 %v608_v21, %v601_v38 }
 0x104   : > { %1561 = vmatprep.subr.bf16.mxu1 %v2058_v52  ;;  %1633 = vmatprep.subr.bf16.mxu0 %v2058_v52  ;;  %v603_v33 = vand.u32 4294901760, %v602_v45  ;;  %v616_v34 = vsub.f32 %v2601_v12, %v615_v46  ;;  %v1649_v9 = vpack.c.bf16 %v622_v28, %v615_v46 }
 0x105   : > { %1391 = vmatprep.mubr.msk.f32.mxu1 %vm2059_vm9, %v2060_v60  ;;  %1496 = vmatprep.mubr.msk.f32.mxu0 %vm2059_vm9, %v2060_v60  ;;  %v1652_v18 = vpack.c.bf16 %v636_v58, %v629_v54 }
 0x106   : > { %v617_v63 = vand.u32 4294901760, %v616_v34  ;;  %v1574_v0 = vpack.c.bf16 %v610_v56, %v603_v33 }
 0x107   : > { %1563 = vmatpush3.bf16.msra.mxu1 %v1562_v10  ;;  %1635 = vmatpush3.bf16.msra.mxu0 %v1634_v5  ;;  %v630_v5 = vsub.f32 %v2621_v27, %v629_v54 }
 0x108   : > { %1564 = vmatprep.subr.bf16.mxu1 %v2058_v52  ;;  %1636 = vmatprep.subr.bf16.mxu0 %v2058_v52  ;;  %v1577_v7 = vpack.c.bf16 %v624_v1, %v617_v63 }
 0x109   : > { %v631_v10 = vand.u32 4294901760, %v630_v5 }
 0x10b   : > { %1566 = vmatpush3.bf16.msra.mxu1 %v1565_v13  ;;  %1638 = vmatpush3.bf16.msra.mxu0 %v1637_v35  ;;  %v1580_v11 = vpack.c.bf16 %v638_v30, %v631_v10  ;;  %v1583_v13 = vpack.c.bf16 %v2485_v16, %v2481_v14  ;;  %v1586_v35 = vpack.c.bf16 %v2503_v23, %v2501_v22 }
 0x10c   : > { %1567 = vmatprep.subr.bf16.mxu1 %v2058_v52  ;;  %1639 = vmatprep.subr.bf16.mxu0 %v2058_v52  ;;  %v1589_v14 = vpack.c.bf16 %v2530_v32, %v2528_v31 }
 0x10f   : > { %1569 = vmatpush3.bf16.msra.mxu1 %v1568_v48  ;;  %1641 = vmatpush3.bf16.msra.mxu0 %v1640_v43 }
 0x110   : > { %1570 = vmatprep.subr.bf16.mxu1 %v2058_v52  ;;  %1642 = vmatprep.subr.bf16.mxu0 %v2058_v52 }
 0x113   : > { %1572 = vmatpush3.bf16.msra.mxu1 %v1571_v55  ;;  %1644 = vmatpush3.bf16.msra.mxu0 %v1643_v29 }
 0x114   : > { %1573 = vmatprep.subr.bf16.mxu1 %v2058_v52  ;;  %1645 = vmatprep.subr.bf16.mxu0 %v2058_v52 }
 0x117   : > { %1575 = vmatpush3.bf16.msra.mxu1 %v1574_v0  ;;  %1647 = vmatpush3.bf16.msra.mxu0 %v1646_v59 }
 0x118   : > { %1576 = vmatprep.subr.bf16.mxu1 %v2058_v52  ;;  %1648 = vmatprep.subr.bf16.mxu0 %v2058_v52 }
 0x11b   : > { %1578 = vmatpush3.bf16.msra.mxu1 %v1577_v7  ;;  %1650 = vmatpush3.bf16.msra.mxu0 %v1649_v9 }
 0x11c   : > { %1579 = vmatprep.subr.bf16.mxu1 %v2058_v52  ;;  %1651 = vmatprep.subr.bf16.mxu0 %v2058_v52 }
 0x11f   : > { %1581 = vmatpush3.bf16.msra.mxu1 %v1580_v11  ;;  %1653 = vmatpush3.bf16.msra.mxu0 %v1652_v18 }
 0x120   : > { %1582 = vmatprep.subr.bf16.mxu1 %v2058_v52  ;;  %1654 = vmatprep.subr.bf16.mxu0 %v2058_v52 }
 0x122   : > { %1392 = vmatmul.mubr.f32.vlgmr.msra.gmra.mrb[0].mxu1 %v2483_v15  ;;  %1497 = vmatmul.mubr.f32.vlgmr.msra.gmra.mrb[0].mxu0 %v2483_v15 }
 0x123   : > { %1584 = vmatpush3.bf16.msra.mxu1 %v1583_v13  ;;  %1656 = vmatpush3.bf16.msra.mxu0 %v2445_v61  ;;  %v1592_v61 = vpack.c.bf16 %v2551_v42, %v2549_v41 }
 0x124   : > { %1585 = vmatprep.subr.bf16.mxu1 %v2058_v52  ;;  %1657 = vmatprep.subr.bf16.mxu0 %v2058_v52 }
 0x125   : > { %1426 = vmatprep.mubr.msk.f32.mxu1 %vm2059_vm9, %v2060_v60  ;;  %1531 = vmatprep.mubr.msk.f32.mxu0 %vm2059_vm9, %v2060_v60  ;;  %v1595_v60 = vpack.c.bf16 %v2572_v53, %v2569_v51 }
 0x127   : > { %1587 = vmatpush3.bf16.msra.mxu1 %v1586_v35  ;;  %1659 = vmatpush3.bf16.msra.mxu0 %v2449_v62  ;;  %v1598_v62 = vpack.c.bf16 %v2590_v4, %v2585_v2 }
 0x128   : > { %1588 = vmatprep.subr.bf16.mxu1 %v2058_v52  ;;  %1660 = vmatprep.subr.bf16.mxu0 %v2058_v52 }
 0x12b   : > { %1590 = vmatpush3.bf16.msra.mxu1 %v1589_v14  ;;  %1662 = vmatpush3.bf16.msra.mxu0 %v2457_v3  ;;  %v1601_v3 = vpack.c.bf16 %v2606_v19, %v2601_v12 }
 0x12c   : > { %1591 = vmatprep.subr.bf16.mxu1 %v2058_v52  ;;  %1663 = vmatprep.subr.bf16.mxu0 %v2058_v52 }
 0x12f   : > { %1593 = vmatpush3.bf16.msra.mxu1 %v1592_v61  ;;  %1665 = vmatpush3.bf16.msra.mxu0 %v2469_v8  ;;  %v1604_v8 = vpack.c.bf16 %v2626_v40, %v2621_v27 }
 0x130   : > { %1594 = vmatprep.subr.bf16.mxu1 %v2058_v52  ;;  %1666 = vmatprep.subr.bf16.mxu0 %v2058_v52 }
 0x133   : > { %1596 = vmatpush3.bf16.msra.mxu1 %v1595_v60  ;;  %1668 = vmatpush3.bf16.msra.mxu0 %v2489_v17 }
 0x134   : > { %1597 = vmatprep.subr.bf16.mxu1 %v2058_v52  ;;  %1669 = vmatprep.subr.bf16.mxu0 %v2058_v52 }
 0x137   : > { %1599 = vmatpush3.bf16.msra.mxu1 %v1598_v62  ;;  %1671 = vmatpush3.bf16.msra.mxu0 %v2515_v26 }
 0x138   : > { %1600 = vmatprep.subr.bf16.mxu1 %v2058_v52  ;;  %1672 = vmatprep.subr.bf16.mxu0 %v2058_v52 }
 0x13b   : > { %1602 = vmatpush3.bf16.msra.mxu1 %v1601_v3  ;;  %1674 = vmatpush3.bf16.msra.mxu0 %v2542_v37 }
 0x13c   : > { %1603 = vmatprep.subr.bf16.mxu1 %v2058_v52  ;;  %1675 = vmatprep.subr.bf16.mxu0 %v2058_v52 }
 0x13f   : > { %1605 = vmatpush3.bf16.msra.mxu1 %v1604_v8  ;;  %1677 = vmatpush3.bf16.msra.mxu0 %v2563_v47 }
 0x142   : > { %1427 = vmatmul.mubr.f32.vlgmr.msra.gmra.mrb[0].mxu1 %v2507_v25  ;;  %1532 = vmatmul.mubr.f32.vlgmr.msra.gmra.mrb[0].mxu0 %v2483_v15 }
 0x215   : > { %v779_v16 = vpop.f32.mrb[0].mxu1  ;;  %v1074_v17 = vpop.f32.mrb[0].mxu0 }
 0x216   : > { %v1678_v22 = vadd.f32 %v1074_v17, %v779_v16  ;;  %v1428_v23 = vpop.f32.mrb[1].mxu1  ;;  %v1533_v26 = vpop.f32.mrb[1].mxu0 }
 0x218   : > { %1078 = vst [vmem:[%s2816_s17] sm:$0xff] %v1678_v22 }
 0x219   : > { %1925 = shalt.err (!%p1922_p7)
}
 0x21a   : > { %s1926_s29 = scalar_lea.hbm %s2702_s11, 128  ;;  %s1930_s4 = scalar_lea.hbm %s2765_s6, 512 }
 0x21b   : > { %p1927_p0 = scmp.ne.s32.totalorder %s2702_s11, %s1926_s29  ;;  %p1931_p5 = scmp.lt.u32.totalorder %s2702_s11, %s2765_s6 }
 0x21c   : > { %p1932_p6 = scmp.lt.u32.totalorder %s1930_s4, %s1926_s29  ;;  %p1934_p4 = scmp.lt.u32.totalorder %s1926_s29, %s2702_s11 }
 0x21d   : > { %p1928_p2 = pnand %p1927_p0, %p2818_p11 }
 0x21e   : > { %p1933_p9 = por %p1932_p6, %p1931_p5 }
 0x21f   : > { %p1929_p8 = pneg %p1928_p2 }
 0x220   : > { %p1935_p12 = por %p1934_p4, %p1933_p9 }
 0x222   : > { %p1936_p13 = pnand %p1935_p12, %p1929_p8 }
 0x224   : > { %1939 = shalt.err (!%p1936_p13)
}
 0x225   : > { %1695 = dma.vmem_to_hbm [thread:$0]  (%p2818_p11), %s2704_s16, 128, %s2702_s11, %s1080_s1  }
 0x226 PF: > { %p1714_p1 = scmp.ge.s32.totalorder %s2036_s26, 2  ;;  %s1106_s22 = sand.u32 1, %s2004_s3  }
 0x227   : > { %p2819_p10 = scmp.ne.s32.totalorder %s2790_s8, 0  ;;  %s1107_s23 = scalar_lea.sflag [#allocation10], %s1106_s22 }
 0x229   : > { %p1708_p3 = pnand %p1714_p1, %p2819_p10 }
 0x22b   : > { %1999 = dma.done.wait (!%p1708_p3), %s1107_s23, 128  }
 0x22c   : > { %2001 = vsyncadd (!%p1708_p3), %s1107_s23, 4294967168  ;;  %s39_s26 = sadd.s32 1, %s2036_s26   ;;  %s2820_s21 = sld [smem:[#allocation20_spill]] }
 0x22d   : > { %p36_p7 = scmp.ge.s32.totalorder %s39_s26, 6   ;;  %s2821_s22 = sld [smem:[#allocation21_spill]] }
 0x22e   : > { %s2822_s23 = sld [smem:[#allocation24_spill]]  ;;  %s2823_s24 = sld [smem:[#allocation22_spill]] }
 0x22f   : > { %s2824_s25 = sld [smem:[#allocation23_spill]]  ;;  %s2825_s3 = smov %s2008_s19 }
 0x230   : > { %s2826_s19 = smov %s2012_s20  ;;  %s2827_s20 = smov %s2238_s10 }
 0x231   :  { %38 = sbr.rel (!%p36_p7) target bundleno = 53 (0x35), region = 96 }
 0x238   :  { %1112 = vsyncpa [#allocation9], 1 }
 0x239   :  { %1114 = vsyncpa [#allocation9 + $0x1], 1 }
 0x23a   :  { %1115 = vsyncpa [#allocation10], 1 }
 0x23b   :  { %1117 = vsyncpa [#allocation10 + $0x1], 1 }
 0x23c   :  { %1118 = vsyncpa [#allocation11], 1 }
 0x23d   :  { %1120 = vsyncpa [#allocation11 + $0x1], 1 }

</bundles_post_ra>
